<compile_context>
chip_gen: v7x
topology: tpu7x:2x2x1
jax: 0.10.0
libtpu: 0.0.40
codegen_flags: <defaults>
</compile_context>

<pallas_src>
import functools

import jax
import jax.numpy as jnp
from jax import lax
from jax.experimental import pallas as pl
from jax.experimental.pallas import tpu as pltpu


# ------------------------------ fused Pallas kernel ------------------------------

def _fused_kernel(x_ref, khw_ref, dop_ref, w_ref, pgb_ref, out_ref,
                  t2_ref, z_ref, acc_ref, *,
                  n, cin, d, hw_out, do_, rn, cout, kk, eps, mmdt):
    """One grid step == one sample.  Grid axis is 'arbitrary' (BN stats carried).

    x_ref  : (1, Cin*D, H*W)         one sample of the input (f32)
    khw_ref: (H*W, 4*Ho*Wo)          Kron H/W interp + trailing pad + 4 (kh,kw) shifts
    dop_ref: (Dp*kk, kk*D)           block-diag Kron D interp + pad + row interleave
    w_ref  : (Cout, 2*kk)            conv weights, columns ordered (kd, kh*kw, ci)
    pgb_ref: (Cout, 128)             col0=bias, col1=gamma, col2=beta (lane-padded)
    out_ref: (N, Cout, Do*Ho*Wo)     FULL output, VMEM-resident across the grid
    t2_ref : (kk*D, Ho*Wo)           scratch: rows (khw, ci, d)
    z_ref  : (Dp*kk, Ho*Wo)          scratch: rows (dpi, khw, ci)
    acc_ref: (Cout, 128)             scratch: col0=m0 shift, col1=sum, col2=sumsq
    """
    i = pl.program_id(0)
    blk = cin * d

    # ---- stage 1: H/W trilinear upsample + trailing replicate pad + the 4 (kh,kw)
    #      conv windows, folded into one Kron operator -> one fat MXU matmul.
    xb = x_ref[0].astype(mmdt)                                           # (Cin*D, H*W)
    t = jnp.dot(xb, khw_ref[...], preferred_element_type=jnp.float32)    # (Cin*D, 4*Ho*Wo)
    # Regroup (kh,kw) from lanes into row blocks: 128-aligned lane slices + aligned
    # row-block stores -> no relayout, just 4 small VMEM copies.
    for k in range(4):
        t2_ref[k * blk:(k + 1) * blk, :] = (
            t[:, k * hw_out:(k + 1) * hw_out].astype(mmdt))

    # ---- stage 2: D interp + trailing pad; the block-diagonal Kron operator also
    #      performs the row interleave so z rows come out (dpi, khw, ci)-major.
    z_ref[...] = jnp.dot(dop_ref[...], t2_ref[...],
                         preferred_element_type=jnp.float32).astype(mmdt)

    # ---- stage 3: 2x2x2 conv as Do fat-K matmuls: (Cout, 2*kk) x (2*kk, Ho*Wo).
    #      z rows [od*kk : od*kk+2*kk) hold depths od (kd=0) and od+1 (kd=1).
    w01 = w_ref[...]
    bias = pgb_ref[:, 0:1]
    bfull = jnp.broadcast_to(bias, (cout, hw_out))                       # hoisted broadcast
    y_slab = out_ref.at[i]                                               # (Cout, rn) view
    for od in range(do_):
        zs = z_ref[od * kk:(od + 2) * kk, :]                             # (2*kk, Ho*Wo)
        y = jnp.dot(w01, zs, preferred_element_type=jnp.float32) + bfull
        y_slab[:, od * hw_out:(od + 1) * hw_out] = y

    # ---- stage 4: shifted single-pass per-channel batch stats on VMEM-resident y.
    yfull = y_slab[...]                                                  # (Cout, rn) f32

    @pl.when(i == 0)
    def _():
        acc_ref[:, 0:1] = jnp.sum(yfull, axis=1, keepdims=True) * (1.0 / rn)
        acc_ref[:, 1:3] = jnp.zeros((cout, 2), jnp.float32)

    m0 = acc_ref[:, 0:1]
    dc = yfull - m0
    acc_ref[:, 1:2] = acc_ref[:, 1:2] + jnp.sum(dc, axis=1, keepdims=True)
    acc_ref[:, 2:3] = acc_ref[:, 2:3] + jnp.sum(dc * dc, axis=1, keepdims=True)

    # ---- stage 5 (last step): BatchNorm affine + ReLU in place on the whole
    #      resident output block; it is flushed to HBM exactly once at the end.
    @pl.when(i == n - 1)
    def _():
        r = 1.0 / float(n * rn)
        m0_ = acc_ref[:, 0:1]
        s1 = acc_ref[:, 1:2]
        s2 = acc_ref[:, 2:3]
        mean = m0_ + s1 * r
        var = s2 * r - (s1 * r) * (s1 * r)                # biased variance (PyTorch BN)
        gamma = pgb_ref[:, 1:2]
        beta = pgb_ref[:, 2:3]
        scale = gamma * lax.rsqrt(var + eps)
        shift = beta - mean * scale
        scale_b = jnp.broadcast_to(scale, (cout, rn))
        shift_b = jnp.broadcast_to(shift, (cout, rn))
        for j in range(n):                                # small static unroll over N
            out_ref[j] = jnp.maximum(out_ref[j] * scale_b + shift_b, 0.0)


# --------------------------------- glue / setup ----------------------------------

def _interp_pad_matrix(n_in):
    """(2*n_in + 1, n_in): 1-D linear upsample x2 (align_corners=True) followed by a
    replicate pad of ONE element at the END of the axis (matches F.pad(..., [0,1]))."""
    n_out = 2 * n_in
    idx = jnp.arange(n_out, dtype=jnp.float32)
    if n_in > 1:
        coord = idx * (float(n_in - 1) / float(n_out - 1))
    else:
        coord = jnp.zeros_like(idx)
    lo = jnp.clip(jnp.floor(coord).astype(jnp.int32), 0, n_in - 1)
    hi = jnp.clip(lo + 1, 0, n_in - 1)
    frac = coord - lo.astype(jnp.float32)
    p = jnp.zeros((n_out, n_in), jnp.float32)
    r = jnp.arange(n_out)
    p = p.at[r, lo].add(1.0 - frac)
    p = p.at[r, hi].add(frac)
    return jnp.concatenate([p, p[-1:]], axis=0)            # trailing replicate-pad row


def emnet_up_3d_forward(x, params, *, eps=1e-5, matmul_dtype=jnp.bfloat16):
    """x: (N, Cin, D, H, W) f32 -> (N, Cout, 2D, 2H, 2W) f32.

    matmul_dtype=bfloat16 (default) uses bf16 MXU inputs with f32 accumulation;
    pass jnp.float32 for reference-exact numerics.
    """
    n, cin, d, h, w = x.shape
    conv_w = params["conv_w"]          # (Cout, Cin, 2, 2, 2)
    conv_b = params["conv_b"]          # (Cout,)
    gamma = params["bn_gamma"]         # (Cout,)
    beta = params["bn_beta"]           # (Cout,)
    cout = conv_w.shape[0]

    do_, ho, wo = 2 * d, 2 * h, 2 * w
    dp = do_ + 1
    hw_in = h * w
    hw_out = ho * wo                   # conv matmul lane width (multiple of 128 for h*w>=32)
    rn = do_ * hw_out                  # per-sample per-channel element count
    kk = 4 * cin                       # contraction rows per depth slice (khw x ci)

    # --- interp + trailing-replicate-pad operators (built once per trace) -----------
    pd_m = _interp_pad_matrix(d)                               # (Dp, D)
    ph = _interp_pad_matrix(h)                                 # (Ho+1, H)
    pw = _interp_pad_matrix(w)                                 # (Wo+1, W)
    # Kron-combine H and W; one block per conv offset (kh, kw) -> lanes (khw, ho*wo).
    khw = jnp.stack([jnp.kron(ph[kh:kh + ho, :], pw[kw:kw + wo, :])
                     for kh in range(2) for kw in range(2)], axis=0)     # (4, Ho*Wo, H*W)
    khw_t = khw.reshape(4 * hw_out, hw_in).T.astype(matmul_dtype)        # (H*W, 4*Ho*Wo)

    # D operator: rows (dpi, g), cols (g, d) with g = khw*cin + ci (block-diagonal Kron
    # that also interleaves the rows into the conv-friendly order).
    eye_g = jnp.eye(kk, dtype=jnp.float32)
    dop = (pd_m[:, None, None, :] * eye_g[None, :, :, None]).reshape(
        dp * kk, kk * d).astype(matmul_dtype)                            # (Dp*kk, kk*D)

    # Conv weights: columns ordered (kd, kh, kw, ci) to match z's K ordering.
    w01 = conv_w.transpose(0, 2, 3, 4, 1).reshape(cout, 2 * kk).astype(matmul_dtype)
    # Per-channel params packed + lane-padded: col0=bias, col1=gamma, col2=beta.
    pgb = jnp.zeros((cout, 128), jnp.float32)
    pgb = pgb.at[:, 0].set(conv_b).at[:, 1].set(gamma).at[:, 2].set(beta)

    x3 = x.reshape(n, cin * d, hw_in)                          # pure reshape, no transpose

    itemsize = jnp.dtype(matmul_dtype).itemsize
    flops = n * (2 * (cin * d) * hw_in * (4 * hw_out)
                 + 2 * (dp * kk) * (kk * d) * hw_out
                 + do_ * 2 * cout * (2 * kk) * hw_out)
    bytes_accessed = (n * cin * d * hw_in * 4
                      + hw_in * 4 * hw_out * itemsize
                      + dp * kk * kk * d * itemsize
                      + cout * 2 * kk * itemsize + cout * 128 * 4
                      + n * cout * rn * 4)

    out = pl.pallas_call(
        functools.partial(_fused_kernel,
                          n=n, cin=cin, d=d, hw_out=hw_out, do_=do_, rn=rn,
                          cout=cout, kk=kk, eps=eps, mmdt=matmul_dtype),
        out_shape=jax.ShapeDtypeStruct((n, cout, rn), jnp.float32),
        grid=(n,),
        in_specs=[
            pl.BlockSpec((1, cin * d, hw_in), lambda i: (i, 0, 0)),
            pl.BlockSpec((hw_in, 4 * hw_out), lambda i: (0, 0)),
            pl.BlockSpec((dp * kk, kk * d), lambda i: (0, 0)),
            pl.BlockSpec((cout, 2 * kk), lambda i: (0, 0)),
            pl.BlockSpec((cout, 128), lambda i: (0, 0)),
        ],
        out_specs=pl.BlockSpec((n, cout, rn), lambda i: (0, 0, 0)),
        scratch_shapes=[
            pltpu.VMEM((kk * d, hw_out), matmul_dtype),        # t2: rows (khw, ci, d)
            pltpu.VMEM((dp * kk, hw_out), matmul_dtype),       # z : rows (dpi, khw, ci)
            pltpu.VMEM((cout, 128), jnp.float32),              # BN stats accumulator
        ],
        compiler_params=pltpu.CompilerParams(dimension_semantics=("arbitrary",)),
        cost_estimate=pl.CostEstimate(flops=flops, transcendentals=0,
                                      bytes_accessed=bytes_accessed),
    )(x3, khw_t, dop, w01, pgb)

    return out.reshape(n, cout, do_, ho, wo)


# -------------------------------------- main --------------------------------------

if __name__ == "__main__":
    N, Cin, Cout = 2, 4, 8
    D = H = W = 8

    key = jax.random.PRNGKey(0)
    kx, kw_, kb = jax.random.split(key, 3)

    # Deterministic, PyTorch-like initialization (uniform(-1/sqrt(fan_in), 1/sqrt(fan_in))).
    fan_in = Cin * 2 * 2 * 2
    bound = 1.0 / (fan_in ** 0.5)
    params = dict(
        conv_w=jax.random.uniform(kw_, (Cout, Cin, 2, 2, 2), jnp.float32, -bound, bound),
        conv_b=jax.random.uniform(kb, (Cout,), jnp.float32, -bound, bound),
        bn_gamma=jnp.ones((Cout,), jnp.float32),   # BatchNorm3d default affine init
        bn_beta=jnp.zeros((Cout,), jnp.float32),
    )
    x = jax.random.normal(kx, (N, Cin, D, H, W), dtype=jnp.float32)

    out = jax.jit(emnet_up_3d_forward)(x, params)
    out = jax.block_until_ready(out)

    assert out.shape == (N, Cout, 2 * D, 2 * H, 2 * W), out.shape
    assert bool(jnp.all(out >= 0.0))  # ReLU output
    assert bool(jnp.all(jnp.isfinite(out)))
    print("KERNEL_OK")
</pallas_src>

<mosaic_0001>
module attributes {stable_mosaic.version = 11 : i64} {
  func.func private @main(%arg0: i32) attributes {dimension_semantics = [#tpu.dimension_semantics<core_parallel>], iteration_bounds = array<i64: 2>, tpu.core_type = #tpu.core_type<sc_scalar_subcore>, window_params = []} {
    return
  }
}

module attributes {stable_mosaic.version = 11 : i64} {
  func.func private @main(%arg0: i32) attributes {dimension_semantics = [#tpu.dimension_semantics<core_parallel>], iteration_bounds = array<i64: 2>, tpu.core_type = #tpu.core_type<sc_scalar_subcore>, window_params = []} {
    return
  }
}

module attributes {stable_mosaic.version = 11 : i64} {
  func.func @_fused_kernel(%arg0: i32, %arg1: memref<1x32x64xf32, #tpu.memory_space<vmem>>, %arg2: memref<64x1024xbf16, #tpu.memory_space<vmem>>, %arg3: memref<272x128xbf16, #tpu.memory_space<vmem>>, %arg4: memref<8x32xbf16, #tpu.memory_space<vmem>>, %arg5: memref<8x128xf32, #tpu.memory_space<vmem>>, %arg6: memref<2x8x4096xf32, #tpu.memory_space<vmem>>, %arg7: memref<128x256xbf16, #tpu.memory_space<vmem>>, %arg8: memref<272x256xbf16, #tpu.memory_space<vmem>>, %arg9: memref<8x128xf32, #tpu.memory_space<vmem>>) attributes {dimension_semantics = [#tpu.dimension_semantics<arbitrary>], iteration_bounds = array<i64: 2>, scalar_prefetch = 0 : i64, scratch_operands = 3 : i64, tpu.core_type = #tpu.core_type<tc>, window_params = [{transform_indices = @transform_0, window_bounds = array<i64: 1, 32, 64>}, {pipeline_mode = #tpu.pipeline_mode<synchronous>, transform_indices = @transform_1, window_bounds = array<i64: 64, 1024>}, {pipeline_mode = #tpu.pipeline_mode<synchronous>, transform_indices = @transform_2, window_bounds = array<i64: 272, 128>}, {pipeline_mode = #tpu.pipeline_mode<synchronous>, transform_indices = @transform_3, window_bounds = array<i64: 8, 32>}, {pipeline_mode = #tpu.pipeline_mode<synchronous>, transform_indices = @transform_4, window_bounds = array<i64: 8, 128>}, {pipeline_mode = #tpu.pipeline_mode<synchronous>, transform_indices = @transform_5, window_bounds = array<i64: 2, 8, 4096>}]} {
    %c0 = arith.constant 0 : index
    %c0_0 = arith.constant 0 : index
    %c0_1 = arith.constant 0 : index
    %0 = vector.load %arg1[%c0, %c0_0, %c0_1] : memref<1x32x64xf32, #tpu.memory_space<vmem>>, vector<1x32x64xf32>
    %1 = vector.shape_cast %0 : vector<1x32x64xf32> to vector<32x64xf32>
    %2 = arith.truncf %1 : vector<32x64xf32> to vector<32x64xbf16>
    %c0_2 = arith.constant 0 : index
    %c0_3 = arith.constant 0 : index
    %3 = vector.load %arg2[%c0_2, %c0_3] : memref<64x1024xbf16, #tpu.memory_space<vmem>>, vector<64x1024xbf16>
    %cst = arith.constant dense<0.000000e+00> : vector<32x1024xf32>
    %4 = tpu.matmul %2, %3, %cst {dimension_numbers = #tpu.dot_dimension_numbers<[1], [0], [0], [1], [0, 0, 1, 1], [], []>} : vector<32x64xbf16>, vector<64x1024xbf16>, vector<32x1024xf32> -> vector<32x1024xf32>
    %5 = vector.extract_strided_slice %4 {offsets = [0, 0], sizes = [32, 256], strides = [1, 1]} : vector<32x1024xf32> to vector<32x256xf32>
    %6 = arith.truncf %5 : vector<32x256xf32> to vector<32x256xbf16>
    %c0_4 = arith.constant 0 : index
    %c0_5 = arith.constant 0 : index
    %7 = vector.load %arg7[%c0_4, %c0_5] : memref<128x256xbf16, #tpu.memory_space<vmem>>, vector<32x256xbf16>
    tpu.vector_store %arg7[%c0_4, %c0_5], %6 {strides = array<i32>} : memref<128x256xbf16, #tpu.memory_space<vmem>>, vector<32x256xbf16>,
    %8 = vector.extract_strided_slice %4 {offsets = [0, 256], sizes = [32, 256], strides = [1, 1]} : vector<32x1024xf32> to vector<32x256xf32>
    %9 = arith.truncf %8 : vector<32x256xf32> to vector<32x256xbf16>
    %c32 = arith.constant 32 : index
    %c0_6 = arith.constant 0 : index
    %10 = vector.load %arg7[%c32, %c0_6] : memref<128x256xbf16, #tpu.memory_space<vmem>>, vector<32x256xbf16>
    tpu.vector_store %arg7[%c32, %c0_6], %9 {strides = array<i32>} : memref<128x256xbf16, #tpu.memory_space<vmem>>, vector<32x256xbf16>,
    %11 = vector.extract_strided_slice %4 {offsets = [0, 512], sizes = [32, 256], strides = [1, 1]} : vector<32x1024xf32> to vector<32x256xf32>
    %12 = arith.truncf %11 : vector<32x256xf32> to vector<32x256xbf16>
    %c64 = arith.constant 64 : index
    %c0_7 = arith.constant 0 : index
    %13 = vector.load %arg7[%c64, %c0_7] : memref<128x256xbf16, #tpu.memory_space<vmem>>, vector<32x256xbf16>
    tpu.vector_store %arg7[%c64, %c0_7], %12 {strides = array<i32>} : memref<128x256xbf16, #tpu.memory_space<vmem>>, vector<32x256xbf16>,
    %14 = vector.extract_strided_slice %4 {offsets = [0, 768], sizes = [32, 256], strides = [1, 1]} : vector<32x1024xf32> to vector<32x256xf32>
    %15 = arith.truncf %14 : vector<32x256xf32> to vector<32x256xbf16>
    %c96 = arith.constant 96 : index
    %c0_8 = arith.constant 0 : index
    %16 = vector.load %arg7[%c96, %c0_8] : memref<128x256xbf16, #tpu.memory_space<vmem>>, vector<32x256xbf16>
    tpu.vector_store %arg7[%c96, %c0_8], %15 {strides = array<i32>} : memref<128x256xbf16, #tpu.memory_space<vmem>>, vector<32x256xbf16>,
    %c0_9 = arith.constant 0 : index
    %c0_10 = arith.constant 0 : index
    %17 = vector.load %arg3[%c0_9, %c0_10] : memref<272x128xbf16, #tpu.memory_space<vmem>>, vector<272x128xbf16>
    %c0_11 = arith.constant 0 : index
    %c0_12 = arith.constant 0 : index
    %18 = vector.load %arg7[%c0_11, %c0_12] : memref<128x256xbf16, #tpu.memory_space<vmem>>, vector<128x256xbf16>
    %cst_13 = arith.constant dense<0.000000e+00> : vector<272x256xf32>
    %19 = tpu.matmul %17, %18, %cst_13 {dimension_numbers = #tpu.dot_dimension_numbers<[1], [0], [0], [1], [0, 0, 1, 1], [], []>} : vector<272x128xbf16>, vector<128x256xbf16>, vector<272x256xf32> -> vector<272x256xf32>
    %20 = arith.truncf %19 : vector<272x256xf32> to vector<272x256xbf16>
    %c0_14 = arith.constant 0 : index
    %c0_15 = arith.constant 0 : index
    %21 = vector.load %arg8[%c0_14, %c0_15] : memref<272x256xbf16, #tpu.memory_space<vmem>>, vector<272x256xbf16>
    tpu.vector_store %arg8[%c0_14, %c0_15], %20 {strides = array<i32>} : memref<272x256xbf16, #tpu.memory_space<vmem>>, vector<272x256xbf16>,
    %c0_16 = arith.constant 0 : index
    %c0_17 = arith.constant 0 : index
    %22 = vector.load %arg4[%c0_16, %c0_17] : memref<8x32xbf16, #tpu.memory_space<vmem>>, vector<8x32xbf16>
    %c0_18 = arith.constant 0 : index
    %c0_19 = arith.constant 0 : index
    %23 = vector.load %arg5[%c0_18, %c0_19] : memref<8x128xf32, #tpu.memory_space<vmem>>, vector<8x1xf32>
    %24 = vector.shape_cast %23 : vector<8x1xf32> to vector<8x1xf32>
    %25 = vector.broadcast %24 : vector<8x1xf32> to vector<8x256xf32>
    %c0_20 = arith.constant 0 : index
    %c0_21 = arith.constant 0 : index
    %26 = vector.load %arg8[%c0_20, %c0_21] : memref<272x256xbf16, #tpu.memory_space<vmem>>, vector<32x256xbf16>
    %cst_22 = arith.constant dense<0.000000e+00> : vector<8x256xf32>
    %27 = tpu.matmul %22, %26, %cst_22 {dimension_numbers = #tpu.dot_dimension_numbers<[1], [0], [0], [1], [0, 0, 1, 1], [], []>} : vector<8x32xbf16>, vector<32x256xbf16>, vector<8x256xf32> -> vector<8x256xf32>
    %28 = arith.addf %27, %25 : vector<8x256xf32>
    %c0_i32 = arith.constant 0 : i32
    %c0_i32_23 = arith.constant 0 : i32
    %29 = tpu.memref_slice %arg6[%arg0, %c0_i32, %c0_i32_23] : memref<2x8x4096xf32, #tpu.memory_space<vmem>> -> memref<1x8x4096xf32, #tpu.memory_space<vmem>>
    %30 = tpu.memref_squeeze %29 : memref<1x8x4096xf32, #tpu.memory_space<vmem>> -> memref<8x4096xf32, #tpu.memory_space<vmem>>
    %c0_24 = arith.constant 0 : index
    %c0_25 = arith.constant 0 : index
    %31 = vector.load %30[%c0_24, %c0_25] : memref<8x4096xf32, #tpu.memory_space<vmem>>, vector<8x256xf32>
    tpu.vector_store %30[%c0_24, %c0_25], %28 {strides = array<i32>} : memref<8x4096xf32, #tpu.memory_space<vmem>>, vector<8x256xf32>,
    %c16 = arith.constant 16 : index
    %c0_26 = arith.constant 0 : index
    %32 = vector.load %arg8[%c16, %c0_26] : memref<272x256xbf16, #tpu.memory_space<vmem>>, vector<32x256xbf16>
    %cst_27 = arith.constant dense<0.000000e+00> : vector<8x256xf32>
    %33 = tpu.matmul %22, %32, %cst_27 {dimension_numbers = #tpu.dot_dimension_numbers<[1], [0], [0], [1], [0, 0, 1, 1], [], []>} : vector<8x32xbf16>, vector<32x256xbf16>, vector<8x256xf32> -> vector<8x256xf32>
    %34 = arith.addf %33, %25 : vector<8x256xf32>
    %c0_i32_28 = arith.constant 0 : i32
    %c0_i32_29 = arith.constant 0 : i32
    %35 = tpu.memref_slice %arg6[%arg0, %c0_i32_28, %c0_i32_29] : memref<2x8x4096xf32, #tpu.memory_space<vmem>> -> memref<1x8x4096xf32, #tpu.memory_space<vmem>>
    %36 = tpu.memref_squeeze %35 : memref<1x8x4096xf32, #tpu.memory_space<vmem>> -> memref<8x4096xf32, #tpu.memory_space<vmem>>
    %c0_30 = arith.constant 0 : index
    %c256 = arith.constant 256 : index
    %37 = vector.load %36[%c0_30, %c256] : memref<8x4096xf32, #tpu.memory_space<vmem>>, vector<8x256xf32>
    tpu.vector_store %36[%c0_30, %c256], %34 {strides = array<i32>} : memref<8x4096xf32, #tpu.memory_space<vmem>>, vector<8x256xf32>,
    %c32_31 = arith.constant 32 : index
    %c0_32 = arith.constant 0 : index
    %38 = vector.load %arg8[%c32_31, %c0_32] : memref<272x256xbf16, #tpu.memory_space<vmem>>, vector<32x256xbf16>
    %cst_33 = arith.constant dense<0.000000e+00> : vector<8x256xf32>
    %39 = tpu.matmul %22, %38, %cst_33 {dimension_numbers = #tpu.dot_dimension_numbers<[1], [0], [0], [1], [0, 0, 1, 1], [], []>} : vector<8x32xbf16>, vector<32x256xbf16>, vector<8x256xf32> -> vector<8x256xf32>
    %40 = arith.addf %39, %25 : vector<8x256xf32>
    %c0_i32_34 = arith.constant 0 : i32
    %c0_i32_35 = arith.constant 0 : i32
    %41 = tpu.memref_slice %arg6[%arg0, %c0_i32_34, %c0_i32_35] : memref<2x8x4096xf32, #tpu.memory_space<vmem>> -> memref<1x8x4096xf32, #tpu.memory_space<vmem>>
    %42 = tpu.memref_squeeze %41 : memref<1x8x4096xf32, #tpu.memory_space<vmem>> -> memref<8x4096xf32, #tpu.memory_space<vmem>>
    %c0_36 = arith.constant 0 : index
    %c512 = arith.constant 512 : index
    %43 = vector.load %42[%c0_36, %c512] : memref<8x4096xf32, #tpu.memory_space<vmem>>, vector<8x256xf32>
    tpu.vector_store %42[%c0_36, %c512], %40 {strides = array<i32>} : memref<8x4096xf32, #tpu.memory_space<vmem>>, vector<8x256xf32>,
    %c48 = arith.constant 48 : index
    %c0_37 = arith.constant 0 : index
    %44 = vector.load %arg8[%c48, %c0_37] : memref<272x256xbf16, #tpu.memory_space<vmem>>, vector<32x256xbf16>
    %cst_38 = arith.constant dense<0.000000e+00> : vector<8x256xf32>
    %45 = tpu.matmul %22, %44, %cst_38 {dimension_numbers = #tpu.dot_dimension_numbers<[1], [0], [0], [1], [0, 0, 1, 1], [], []>} : vector<8x32xbf16>, vector<32x256xbf16>, vector<8x256xf32> -> vector<8x256xf32>
    %46 = arith.addf %45, %25 : vector<8x256xf32>
    %c0_i32_39 = arith.constant 0 : i32
    %c0_i32_40 = arith.constant 0 : i32
    %47 = tpu.memref_slice %arg6[%arg0, %c0_i32_39, %c0_i32_40] : memref<2x8x4096xf32, #tpu.memory_space<vmem>> -> memref<1x8x4096xf32, #tpu.memory_space<vmem>>
    %48 = tpu.memref_squeeze %47 : memref<1x8x4096xf32, #tpu.memory_space<vmem>> -> memref<8x4096xf32, #tpu.memory_space<vmem>>
    %c0_41 = arith.constant 0 : index
    %c768 = arith.constant 768 : index
    %49 = vector.load %48[%c0_41, %c768] : memref<8x4096xf32, #tpu.memory_space<vmem>>, vector<8x256xf32>
    tpu.vector_store %48[%c0_41, %c768], %46 {strides = array<i32>} : memref<8x4096xf32, #tpu.memory_space<vmem>>, vector<8x256xf32>,
    %c64_42 = arith.constant 64 : index
    %c0_43 = arith.constant 0 : index
    %50 = vector.load %arg8[%c64_42, %c0_43] : memref<272x256xbf16, #tpu.memory_space<vmem>>, vector<32x256xbf16>
    %cst_44 = arith.constant dense<0.000000e+00> : vector<8x256xf32>
    %51 = tpu.matmul %22, %50, %cst_44 {dimension_numbers = #tpu.dot_dimension_numbers<[1], [0], [0], [1], [0, 0, 1, 1], [], []>} : vector<8x32xbf16>, vector<32x256xbf16>, vector<8x256xf32> -> vector<8x256xf32>
    %52 = arith.addf %51, %25 : vector<8x256xf32>
    %c0_i32_45 = arith.constant 0 : i32
    %c0_i32_46 = arith.constant 0 : i32
    %53 = tpu.memref_slice %arg6[%arg0, %c0_i32_45, %c0_i32_46] : memref<2x8x4096xf32, #tpu.memory_space<vmem>> -> memref<1x8x4096xf32, #tpu.memory_space<vmem>>
    %54 = tpu.memref_squeeze %53 : memref<1x8x4096xf32, #tpu.memory_space<vmem>> -> memref<8x4096xf32, #tpu.memory_space<vmem>>
    %c0_47 = arith.constant 0 : index
    %c1024 = arith.constant 1024 : index
    %55 = vector.load %54[%c0_47, %c1024] : memref<8x4096xf32, #tpu.memory_space<vmem>>, vector<8x256xf32>
    tpu.vector_store %54[%c0_47, %c1024], %52 {strides = array<i32>} : memref<8x4096xf32, #tpu.memory_space<vmem>>, vector<8x256xf32>,
    %c80 = arith.constant 80 : index
    %c0_48 = arith.constant 0 : index
    %56 = vector.load %arg8[%c80, %c0_48] : memref<272x256xbf16, #tpu.memory_space<vmem>>, vector<32x256xbf16>
    %cst_49 = arith.constant dense<0.000000e+00> : vector<8x256xf32>
    %57 = tpu.matmul %22, %56, %cst_49 {dimension_numbers = #tpu.dot_dimension_numbers<[1], [0], [0], [1], [0, 0, 1, 1], [], []>} : vector<8x32xbf16>, vector<32x256xbf16>, vector<8x256xf32> -> vector<8x256xf32>
    %58 = arith.addf %57, %25 : vector<8x256xf32>
    %c0_i32_50 = arith.constant 0 : i32
    %c0_i32_51 = arith.constant 0 : i32
    %59 = tpu.memref_slice %arg6[%arg0, %c0_i32_50, %c0_i32_51] : memref<2x8x4096xf32, #tpu.memory_space<vmem>> -> memref<1x8x4096xf32, #tpu.memory_space<vmem>>
    %60 = tpu.memref_squeeze %59 : memref<1x8x4096xf32, #tpu.memory_space<vmem>> -> memref<8x4096xf32, #tpu.memory_space<vmem>>
    %c0_52 = arith.constant 0 : index
    %c1280 = arith.constant 1280 : index
    %61 = vector.load %60[%c0_52, %c1280] : memref<8x4096xf32, #tpu.memory_space<vmem>>, vector<8x256xf32>
    tpu.vector_store %60[%c0_52, %c1280], %58 {strides = array<i32>} : memref<8x4096xf32, #tpu.memory_space<vmem>>, vector<8x256xf32>,
    %c96_53 = arith.constant 96 : index
    %c0_54 = arith.constant 0 : index
    %62 = vector.load %arg8[%c96_53, %c0_54] : memref<272x256xbf16, #tpu.memory_space<vmem>>, vector<32x256xbf16>
    %cst_55 = arith.constant dense<0.000000e+00> : vector<8x256xf32>
    %63 = tpu.matmul %22, %62, %cst_55 {dimension_numbers = #tpu.dot_dimension_numbers<[1], [0], [0], [1], [0, 0, 1, 1], [], []>} : vector<8x32xbf16>, vector<32x256xbf16>, vector<8x256xf32> -> vector<8x256xf32>
    %64 = arith.addf %63, %25 : vector<8x256xf32>
    %c0_i32_56 = arith.constant 0 : i32
    %c0_i32_57 = arith.constant 0 : i32
    %65 = tpu.memref_slice %arg6[%arg0, %c0_i32_56, %c0_i32_57] : memref<2x8x4096xf32, #tpu.memory_space<vmem>> -> memref<1x8x4096xf32, #tpu.memory_space<vmem>>
    %66 = tpu.memref_squeeze %65 : memref<1x8x4096xf32, #tpu.memory_space<vmem>> -> memref<8x4096xf32, #tpu.memory_space<vmem>>
    %c0_58 = arith.constant 0 : index
    %c1536 = arith.constant 1536 : index
    %67 = vector.load %66[%c0_58, %c1536] : memref<8x4096xf32, #tpu.memory_space<vmem>>, vector<8x256xf32>
    tpu.vector_store %66[%c0_58, %c1536], %64 {strides = array<i32>} : memref<8x4096xf32, #tpu.memory_space<vmem>>, vector<8x256xf32>,
    %c112 = arith.constant 112 : index
    %c0_59 = arith.constant 0 : index
    %68 = vector.load %arg8[%c112, %c0_59] : memref<272x256xbf16, #tpu.memory_space<vmem>>, vector<32x256xbf16>
    %cst_60 = arith.constant dense<0.000000e+00> : vector<8x256xf32>
    %69 = tpu.matmul %22, %68, %cst_60 {dimension_numbers = #tpu.dot_dimension_numbers<[1], [0], [0], [1], [0, 0, 1, 1], [], []>} : vector<8x32xbf16>, vector<32x256xbf16>, vector<8x256xf32> -> vector<8x256xf32>
    %70 = arith.addf %69, %25 : vector<8x256xf32>
    %c0_i32_61 = arith.constant 0 : i32
    %c0_i32_62 = arith.constant 0 : i32
    %71 = tpu.memref_slice %arg6[%arg0, %c0_i32_61, %c0_i32_62] : memref<2x8x4096xf32, #tpu.memory_space<vmem>> -> memref<1x8x4096xf32, #tpu.memory_space<vmem>>
    %72 = tpu.memref_squeeze %71 : memref<1x8x4096xf32, #tpu.memory_space<vmem>> -> memref<8x4096xf32, #tpu.memory_space<vmem>>
    %c0_63 = arith.constant 0 : index
    %c1792 = arith.constant 1792 : index
    %73 = vector.load %72[%c0_63, %c1792] : memref<8x4096xf32, #tpu.memory_space<vmem>>, vector<8x256xf32>
    tpu.vector_store %72[%c0_63, %c1792], %70 {strides = array<i32>} : memref<8x4096xf32, #tpu.memory_space<vmem>>, vector<8x256xf32>,
    %c128 = arith.constant 128 : index
    %c0_64 = arith.constant 0 : index
    %74 = vector.load %arg8[%c128, %c0_64] : memref<272x256xbf16, #tpu.memory_space<vmem>>, vector<32x256xbf16>
    %cst_65 = arith.constant dense<0.000000e+00> : vector<8x256xf32>
    %75 = tpu.matmul %22, %74, %cst_65 {dimension_numbers = #tpu.dot_dimension_numbers<[1], [0], [0], [1], [0, 0, 1, 1], [], []>} : vector<8x32xbf16>, vector<32x256xbf16>, vector<8x256xf32> -> vector<8x256xf32>
    %76 = arith.addf %75, %25 : vector<8x256xf32>
    %c0_i32_66 = arith.constant 0 : i32
    %c0_i32_67 = arith.constant 0 : i32
    %77 = tpu.memref_slice %arg6[%arg0, %c0_i32_66, %c0_i32_67] : memref<2x8x4096xf32, #tpu.memory_space<vmem>> -> memref<1x8x4096xf32, #tpu.memory_space<vmem>>
    %78 = tpu.memref_squeeze %77 : memref<1x8x4096xf32, #tpu.memory_space<vmem>> -> memref<8x4096xf32, #tpu.memory_space<vmem>>
    %c0_68 = arith.constant 0 : index
    %c2048 = arith.constant 2048 : index
    %79 = vector.load %78[%c0_68, %c2048] : memref<8x4096xf32, #tpu.memory_space<vmem>>, vector<8x256xf32>
    tpu.vector_store %78[%c0_68, %c2048], %76 {strides = array<i32>} : memref<8x4096xf32, #tpu.memory_space<vmem>>, vector<8x256xf32>,
    %c144 = arith.constant 144 : index
    %c0_69 = arith.constant 0 : index
    %80 = vector.load %arg8[%c144, %c0_69] : memref<272x256xbf16, #tpu.memory_space<vmem>>, vector<32x256xbf16>
    %cst_70 = arith.constant dense<0.000000e+00> : vector<8x256xf32>
    %81 = tpu.matmul %22, %80, %cst_70 {dimension_numbers = #tpu.dot_dimension_numbers<[1], [0], [0], [1], [0, 0, 1, 1], [], []>} : vector<8x32xbf16>, vector<32x256xbf16>, vector<8x256xf32> -> vector<8x256xf32>
    %82 = arith.addf %81, %25 : vector<8x256xf32>
    %c0_i32_71 = arith.constant 0 : i32
    %c0_i32_72 = arith.constant 0 : i32
    %83 = tpu.memref_slice %arg6[%arg0, %c0_i32_71, %c0_i32_72] : memref<2x8x4096xf32, #tpu.memory_space<vmem>> -> memref<1x8x4096xf32, #tpu.memory_space<vmem>>
    %84 = tpu.memref_squeeze %83 : memref<1x8x4096xf32, #tpu.memory_space<vmem>> -> memref<8x4096xf32, #tpu.memory_space<vmem>>
    %c0_73 = arith.constant 0 : index
    %c2304 = arith.constant 2304 : index
    %85 = vector.load %84[%c0_73, %c2304] : memref<8x4096xf32, #tpu.memory_space<vmem>>, vector<8x256xf32>
    tpu.vector_store %84[%c0_73, %c2304], %82 {strides = array<i32>} : memref<8x4096xf32, #tpu.memory_space<vmem>>, vector<8x256xf32>,
    %c160 = arith.constant 160 : index
    %c0_74 = arith.constant 0 : index
    %86 = vector.load %arg8[%c160, %c0_74] : memref<272x256xbf16, #tpu.memory_space<vmem>>, vector<32x256xbf16>
    %cst_75 = arith.constant dense<0.000000e+00> : vector<8x256xf32>
    %87 = tpu.matmul %22, %86, %cst_75 {dimension_numbers = #tpu.dot_dimension_numbers<[1], [0], [0], [1], [0, 0, 1, 1], [], []>} : vector<8x32xbf16>, vector<32x256xbf16>, vector<8x256xf32> -> vector<8x256xf32>
    %88 = arith.addf %87, %25 : vector<8x256xf32>
    %c0_i32_76 = arith.constant 0 : i32
    %c0_i32_77 = arith.constant 0 : i32
    %89 = tpu.memref_slice %arg6[%arg0, %c0_i32_76, %c0_i32_77] : memref<2x8x4096xf32, #tpu.memory_space<vmem>> -> memref<1x8x4096xf32, #tpu.memory_space<vmem>>
    %90 = tpu.memref_squeeze %89 : memref<1x8x4096xf32, #tpu.memory_space<vmem>> -> memref<8x4096xf32, #tpu.memory_space<vmem>>
    %c0_78 = arith.constant 0 : index
    %c2560 = arith.constant 2560 : index
    %91 = vector.load %90[%c0_78, %c2560] : memref<8x4096xf32, #tpu.memory_space<vmem>>, vector<8x256xf32>
    tpu.vector_store %90[%c0_78, %c2560], %88 {strides = array<i32>} : memref<8x4096xf32, #tpu.memory_space<vmem>>, vector<8x256xf32>,
    %c176 = arith.constant 176 : index
    %c0_79 = arith.constant 0 : index
    %92 = vector.load %arg8[%c176, %c0_79] : memref<272x256xbf16, #tpu.memory_space<vmem>>, vector<32x256xbf16>
    %cst_80 = arith.constant dense<0.000000e+00> : vector<8x256xf32>
    %93 = tpu.matmul %22, %92, %cst_80 {dimension_numbers = #tpu.dot_dimension_numbers<[1], [0], [0], [1], [0, 0, 1, 1], [], []>} : vector<8x32xbf16>, vector<32x256xbf16>, vector<8x256xf32> -> vector<8x256xf32>
    %94 = arith.addf %93, %25 : vector<8x256xf32>
    %c0_i32_81 = arith.constant 0 : i32
    %c0_i32_82 = arith.constant 0 : i32
    %95 = tpu.memref_slice %arg6[%arg0, %c0_i32_81, %c0_i32_82] : memref<2x8x4096xf32, #tpu.memory_space<vmem>> -> memref<1x8x4096xf32, #tpu.memory_space<vmem>>
    %96 = tpu.memref_squeeze %95 : memref<1x8x4096xf32, #tpu.memory_space<vmem>> -> memref<8x4096xf32, #tpu.memory_space<vmem>>
    %c0_83 = arith.constant 0 : index
    %c2816 = arith.constant 2816 : index
    %97 = vector.load %96[%c0_83, %c2816] : memref<8x4096xf32, #tpu.memory_space<vmem>>, vector<8x256xf32>
    tpu.vector_store %96[%c0_83, %c2816], %94 {strides = array<i32>} : memref<8x4096xf32, #tpu.memory_space<vmem>>, vector<8x256xf32>,
    %c192 = arith.constant 192 : index
    %c0_84 = arith.constant 0 : index
    %98 = vector.load %arg8[%c192, %c0_84] : memref<272x256xbf16, #tpu.memory_space<vmem>>, vector<32x256xbf16>
    %cst_85 = arith.constant dense<0.000000e+00> : vector<8x256xf32>
    %99 = tpu.matmul %22, %98, %cst_85 {dimension_numbers = #tpu.dot_dimension_numbers<[1], [0], [0], [1], [0, 0, 1, 1], [], []>} : vector<8x32xbf16>, vector<32x256xbf16>, vector<8x256xf32> -> vector<8x256xf32>
    %100 = arith.addf %99, %25 : vector<8x256xf32>
    %c0_i32_86 = arith.constant 0 : i32
    %c0_i32_87 = arith.constant 0 : i32
    %101 = tpu.memref_slice %arg6[%arg0, %c0_i32_86, %c0_i32_87] : memref<2x8x4096xf32, #tpu.memory_space<vmem>> -> memref<1x8x4096xf32, #tpu.memory_space<vmem>>
    %102 = tpu.memref_squeeze %101 : memref<1x8x4096xf32, #tpu.memory_space<vmem>> -> memref<8x4096xf32, #tpu.memory_space<vmem>>
    %c0_88 = arith.constant 0 : index
    %c3072 = arith.constant 3072 : index
    %103 = vector.load %102[%c0_88, %c3072] : memref<8x4096xf32, #tpu.memory_space<vmem>>, vector<8x256xf32>
    tpu.vector_store %102[%c0_88, %c3072], %100 {strides = array<i32>} : memref<8x4096xf32, #tpu.memory_space<vmem>>, vector<8x256xf32>,
    %c208 = arith.constant 208 : index
    %c0_89 = arith.constant 0 : index
    %104 = vector.load %arg8[%c208, %c0_89] : memref<272x256xbf16, #tpu.memory_space<vmem>>, vector<32x256xbf16>
    %cst_90 = arith.constant dense<0.000000e+00> : vector<8x256xf32>
    %105 = tpu.matmul %22, %104, %cst_90 {dimension_numbers = #tpu.dot_dimension_numbers<[1], [0], [0], [1], [0, 0, 1, 1], [], []>} : vector<8x32xbf16>, vector<32x256xbf16>, vector<8x256xf32> -> vector<8x256xf32>
    %106 = arith.addf %105, %25 : vector<8x256xf32>
    %c0_i32_91 = arith.constant 0 : i32
    %c0_i32_92 = arith.constant 0 : i32
    %107 = tpu.memref_slice %arg6[%arg0, %c0_i32_91, %c0_i32_92] : memref<2x8x4096xf32, #tpu.memory_space<vmem>> -> memref<1x8x4096xf32, #tpu.memory_space<vmem>>
    %108 = tpu.memref_squeeze %107 : memref<1x8x4096xf32, #tpu.memory_space<vmem>> -> memref<8x4096xf32, #tpu.memory_space<vmem>>
    %c0_93 = arith.constant 0 : index
    %c3328 = arith.constant 3328 : index
    %109 = vector.load %108[%c0_93, %c3328] : memref<8x4096xf32, #tpu.memory_space<vmem>>, vector<8x256xf32>
    tpu.vector_store %108[%c0_93, %c3328], %106 {strides = array<i32>} : memref<8x4096xf32, #tpu.memory_space<vmem>>, vector<8x256xf32>,
    %c224 = arith.constant 224 : index
    %c0_94 = arith.constant 0 : index
    %110 = vector.load %arg8[%c224, %c0_94] : memref<272x256xbf16, #tpu.memory_space<vmem>>, vector<32x256xbf16>
    %cst_95 = arith.constant dense<0.000000e+00> : vector<8x256xf32>
    %111 = tpu.matmul %22, %110, %cst_95 {dimension_numbers = #tpu.dot_dimension_numbers<[1], [0], [0], [1], [0, 0, 1, 1], [], []>} : vector<8x32xbf16>, vector<32x256xbf16>, vector<8x256xf32> -> vector<8x256xf32>
    %112 = arith.addf %111, %25 : vector<8x256xf32>
    %c0_i32_96 = arith.constant 0 : i32
    %c0_i32_97 = arith.constant 0 : i32
    %113 = tpu.memref_slice %arg6[%arg0, %c0_i32_96, %c0_i32_97] : memref<2x8x4096xf32, #tpu.memory_space<vmem>> -> memref<1x8x4096xf32, #tpu.memory_space<vmem>>
    %114 = tpu.memref_squeeze %113 : memref<1x8x4096xf32, #tpu.memory_space<vmem>> -> memref<8x4096xf32, #tpu.memory_space<vmem>>
    %c0_98 = arith.constant 0 : index
    %c3584 = arith.constant 3584 : index
    %115 = vector.load %114[%c0_98, %c3584] : memref<8x4096xf32, #tpu.memory_space<vmem>>, vector<8x256xf32>
    tpu.vector_store %114[%c0_98, %c3584], %112 {strides = array<i32>} : memref<8x4096xf32, #tpu.memory_space<vmem>>, vector<8x256xf32>,
    %c240 = arith.constant 240 : index
    %c0_99 = arith.constant 0 : index
    %116 = vector.load %arg8[%c240, %c0_99] : memref<272x256xbf16, #tpu.memory_space<vmem>>, vector<32x256xbf16>
    %cst_100 = arith.constant dense<0.000000e+00> : vector<8x256xf32>
    %117 = tpu.matmul %22, %116, %cst_100 {dimension_numbers = #tpu.dot_dimension_numbers<[1], [0], [0], [1], [0, 0, 1, 1], [], []>} : vector<8x32xbf16>, vector<32x256xbf16>, vector<8x256xf32> -> vector<8x256xf32>
    %118 = arith.addf %117, %25 : vector<8x256xf32>
    %c0_i32_101 = arith.constant 0 : i32
    %c0_i32_102 = arith.constant 0 : i32
    %119 = tpu.memref_slice %arg6[%arg0, %c0_i32_101, %c0_i32_102] : memref<2x8x4096xf32, #tpu.memory_space<vmem>> -> memref<1x8x4096xf32, #tpu.memory_space<vmem>>
    %120 = tpu.memref_squeeze %119 : memref<1x8x4096xf32, #tpu.memory_space<vmem>> -> memref<8x4096xf32, #tpu.memory_space<vmem>>
    %c0_103 = arith.constant 0 : index
    %c3840 = arith.constant 3840 : index
    %121 = vector.load %120[%c0_103, %c3840] : memref<8x4096xf32, #tpu.memory_space<vmem>>, vector<8x256xf32>
    tpu.vector_store %120[%c0_103, %c3840], %118 {strides = array<i32>} : memref<8x4096xf32, #tpu.memory_space<vmem>>, vector<8x256xf32>,
    %122 = arith.index_cast %arg0 : i32 to index
    %c0_104 = arith.constant 0 : index
    %c0_105 = arith.constant 0 : index
    %123 = vector.load %arg6[%122, %c0_104, %c0_105] : memref<2x8x4096xf32, #tpu.memory_space<vmem>>, vector<1x8x4096xf32>
    %124 = vector.shape_cast %123 : vector<1x8x4096xf32> to vector<8x4096xf32>
    %c0_i32_106 = arith.constant 0 : i32
    %125 = arith.cmpi eq, %arg0, %c0_i32_106 : i32
    %126 = arith.extui %125 : i1 to i32
    %c0_i32_107 = arith.constant 0 : i32
    %127 = arith.cmpi ne, %126, %c0_i32_107 : i32
    scf.if %127 {
      %cst_119 = arith.constant dense<0.000000e+00> : vector<8xf32>
      %145 = vector.multi_reduction <add>, %124, %cst_119 [1] : vector<8x4096xf32> to vector<8xf32>
      %146 = vector.shape_cast %145 : vector<8xf32> to vector<8x1xf32>
      %cst_120 = arith.constant 2.44140625E-4 : f32
      %147 = vector.broadcast %cst_120 : f32 to vector<8x1xf32>
      %148 = arith.mulf %146, %147 : vector<8x1xf32>
      %c0_121 = arith.constant 0 : index
      %c0_122 = arith.constant 0 : index
      %149 = vector.load %arg9[%c0_121, %c0_122] : memref<8x128xf32, #tpu.memory_space<vmem>>, vector<8x1xf32>
      tpu.vector_store %arg9[%c0_121, %c0_122], %148 {strides = array<i32>} : memref<8x128xf32, #tpu.memory_space<vmem>>, vector<8x1xf32>,
      %cst_123 = arith.constant 0.000000e+00 : f32
      %150 = vector.broadcast %cst_123 : f32 to vector<8x2xf32>
      %c0_124 = arith.constant 0 : index
      %c1_125 = arith.constant 1 : index
      %151 = vector.load %arg9[%c0_124, %c1_125] : memref<8x128xf32, #tpu.memory_space<vmem>>, vector<8x2xf32>
      tpu.vector_store %arg9[%c0_124, %c1_125], %150 {strides = array<i32>} : memref<8x128xf32, #tpu.memory_space<vmem>>, vector<8x2xf32>,
    } else {
    }
    %c0_108 = arith.constant 0 : index
    %c0_109 = arith.constant 0 : index
    %128 = vector.load %arg9[%c0_108, %c0_109] : memref<8x128xf32, #tpu.memory_space<vmem>>, vector<8x1xf32>
    %129 = vector.broadcast %128 : vector<8x1xf32> to vector<8x4096xf32>
    %130 = arith.subf %124, %129 : vector<8x4096xf32>
    %c0_110 = arith.constant 0 : index
    %c1 = arith.constant 1 : index
    %131 = vector.load %arg9[%c0_110, %c1] : memref<8x128xf32, #tpu.memory_space<vmem>>, vector<8x1xf32>
    %cst_111 = arith.constant dense<0.000000e+00> : vector<8xf32>
    %132 = vector.multi_reduction <add>, %130, %cst_111 [1] : vector<8x4096xf32> to vector<8xf32>
    %133 = vector.shape_cast %132 : vector<8xf32> to vector<8x1xf32>
    %134 = arith.addf %131, %133 : vector<8x1xf32>
    %c0_112 = arith.constant 0 : index
    %c1_113 = arith.constant 1 : index
    %135 = vector.load %arg9[%c0_112, %c1_113] : memref<8x128xf32, #tpu.memory_space<vmem>>, vector<8x1xf32>
    tpu.vector_store %arg9[%c0_112, %c1_113], %134 {strides = array<i32>} : memref<8x128xf32, #tpu.memory_space<vmem>>, vector<8x1xf32>,
    %c0_114 = arith.constant 0 : index
    %c2 = arith.constant 2 : index
    %136 = vector.load %arg9[%c0_114, %c2] : memref<8x128xf32, #tpu.memory_space<vmem>>, vector<8x1xf32>
    %137 = arith.mulf %130, %130 : vector<8x4096xf32>
    %cst_115 = arith.constant dense<0.000000e+00> : vector<8xf32>
    %138 = vector.multi_reduction <add>, %137, %cst_115 [1] : vector<8x4096xf32> to vector<8xf32>
    %139 = vector.shape_cast %138 : vector<8xf32> to vector<8x1xf32>
    %140 = arith.addf %136, %139 : vector<8x1xf32>
    %c0_116 = arith.constant 0 : index
    %c2_117 = arith.constant 2 : index
    %141 = vector.load %arg9[%c0_116, %c2_117] : memref<8x128xf32, #tpu.memory_space<vmem>>, vector<8x1xf32>
    tpu.vector_store %arg9[%c0_116, %c2_117], %140 {strides = array<i32>} : memref<8x128xf32, #tpu.memory_space<vmem>>, vector<8x1xf32>,
    %c1_i32 = arith.constant 1 : i32
    %142 = arith.cmpi eq, %arg0, %c1_i32 : i32
    %143 = arith.extui %142 : i1 to i32
    %c0_i32_118 = arith.constant 0 : i32
    %144 = arith.cmpi ne, %143, %c0_i32_118 : i32
    scf.if %144 {
      %c0_119 = arith.constant 0 : index
      %c0_120 = arith.constant 0 : index
      %145 = vector.load %arg9[%c0_119, %c0_120] : memref<8x128xf32, #tpu.memory_space<vmem>>, vector<8x1xf32>
      %c0_121 = arith.constant 0 : index
      %c1_122 = arith.constant 1 : index
      %146 = vector.load %arg9[%c0_121, %c1_122] : memref<8x128xf32, #tpu.memory_space<vmem>>, vector<8x1xf32>
      %c0_123 = arith.constant 0 : index
      %c2_124 = arith.constant 2 : index
      %147 = vector.load %arg9[%c0_123, %c2_124] : memref<8x128xf32, #tpu.memory_space<vmem>>, vector<8x1xf32>
      %cst_125 = arith.constant 1.22070313E-4 : f32
      %148 = vector.broadcast %cst_125 : f32 to vector<8x1xf32>
      %149 = arith.mulf %146, %148 : vector<8x1xf32>
      %150 = arith.addf %145, %149 : vector<8x1xf32>
      %cst_126 = arith.constant 1.22070313E-4 : f32
      %151 = vector.broadcast %cst_126 : f32 to vector<8x1xf32>
      %152 = arith.mulf %147, %151 : vector<8x1xf32>
      %cst_127 = arith.constant 1.22070313E-4 : f32
      %153 = vector.broadcast %cst_127 : f32 to vector<8x1xf32>
      %154 = arith.mulf %146, %153 : vector<8x1xf32>
      %cst_128 = arith.constant 1.22070313E-4 : f32
      %155 = vector.broadcast %cst_128 : f32 to vector<8x1xf32>
      %156 = arith.mulf %146, %155 : vector<8x1xf32>
      %157 = arith.mulf %154, %156 : vector<8x1xf32>
      %158 = arith.subf %152, %157 : vector<8x1xf32>
      %c0_129 = arith.constant 0 : index
      %c1_130 = arith.constant 1 : index
      %159 = vector.load %arg5[%c0_129, %c1_130] : memref<8x128xf32, #tpu.memory_space<vmem>>, vector<8x1xf32>
      %c0_131 = arith.constant 0 : index
      %c2_132 = arith.constant 2 : index
      %160 = vector.load %arg5[%c0_131, %c2_132] : memref<8x128xf32, #tpu.memory_space<vmem>>, vector<8x1xf32>
      %cst_133 = arith.constant 9.99999974E-6 : f32
      %161 = vector.broadcast %cst_133 : f32 to vector<8x1xf32>
      %162 = arith.addf %158, %161 : vector<8x1xf32>
      %163 = math.rsqrt %162 : vector<8x1xf32>
      %164 = arith.mulf %159, %163 : vector<8x1xf32>
      %165 = arith.mulf %150, %164 : vector<8x1xf32>
      %166 = arith.subf %160, %165 : vector<8x1xf32>
      %167 = vector.shape_cast %164 : vector<8x1xf32> to vector<8x1xf32>
      %168 = vector.broadcast %167 : vector<8x1xf32> to vector<8x4096xf32>
      %169 = vector.shape_cast %166 : vector<8x1xf32> to vector<8x1xf32>
      %170 = vector.broadcast %169 : vector<8x1xf32> to vector<8x4096xf32>
      %c0_134 = arith.constant 0 : index
      %c0_135 = arith.constant 0 : index
      %c0_136 = arith.constant 0 : index
      %171 = vector.load %arg6[%c0_134, %c0_135, %c0_136] : memref<2x8x4096xf32, #tpu.memory_space<vmem>>, vector<1x8x4096xf32>
      %172 = vector.shape_cast %171 : vector<1x8x4096xf32> to vector<8x4096xf32>
      %173 = arith.mulf %172, %168 : vector<8x4096xf32>
      %174 = arith.addf %173, %170 : vector<8x4096xf32>
      %cst_137 = arith.constant 0.000000e+00 : f32
      %175 = vector.broadcast %cst_137 : f32 to vector<8x4096xf32>
      %176 = arith.maximumf %174, %175 : vector<8x4096xf32>
      %c0_138 = arith.constant 0 : index
      %c0_139 = arith.constant 0 : index
      %c0_140 = arith.constant 0 : index
      %177 = vector.load %arg6[%c0_138, %c0_139, %c0_140] : memref<2x8x4096xf32, #tpu.memory_space<vmem>>, vector<1x8x4096xf32>
      %178 = vector.shape_cast %177 : vector<1x8x4096xf32> to vector<8x4096xf32>
      %179 = vector.shape_cast %176 : vector<8x4096xf32> to vector<1x8x4096xf32>
      tpu.vector_store %arg6[%c0_138, %c0_139, %c0_140], %179 {strides = array<i32>} : memref<2x8x4096xf32, #tpu.memory_space<vmem>>, vector<1x8x4096xf32>,
      %c1_141 = arith.constant 1 : index
      %c0_142 = arith.constant 0 : index
      %c0_143 = arith.constant 0 : index
      %180 = vector.load %arg6[%c1_141, %c0_142, %c0_143] : memref<2x8x4096xf32, #tpu.memory_space<vmem>>, vector<1x8x4096xf32>
      %181 = vector.shape_cast %180 : vector<1x8x4096xf32> to vector<8x4096xf32>
      %182 = arith.mulf %181, %168 : vector<8x4096xf32>
      %183 = arith.addf %182, %170 : vector<8x4096xf32>
      %cst_144 = arith.constant 0.000000e+00 : f32
      %184 = vector.broadcast %cst_144 : f32 to vector<8x4096xf32>
      %185 = arith.maximumf %183, %184 : vector<8x4096xf32>
      %c1_145 = arith.constant 1 : index
      %c0_146 = arith.constant 0 : index
      %c0_147 = arith.constant 0 : index
      %186 = vector.load %arg6[%c1_145, %c0_146, %c0_147] : memref<2x8x4096xf32, #tpu.memory_space<vmem>>, vector<1x8x4096xf32>
      %187 = vector.shape_cast %186 : vector<1x8x4096xf32> to vector<8x4096xf32>
      %188 = vector.shape_cast %185 : vector<8x4096xf32> to vector<1x8x4096xf32>
      tpu.vector_store %arg6[%c1_145, %c0_146, %c0_147], %188 {strides = array<i32>} : memref<2x8x4096xf32, #tpu.memory_space<vmem>>, vector<1x8x4096xf32>,
    } else {
    }
    return
  }
  func.func @transform_0(%arg0: i32) -> (i32, i32, i32) {
    %c0_i32 = arith.constant 0 : i32
    %c0_i32_0 = arith.constant 0 : i32
    %c0_i32_1 = arith.constant 0 : i32
    return %arg0, %c0_i32, %c0_i32_0 : i32, i32, i32
  }
  func.func @transform_1(%arg0: i32) -> (i32, i32) {
    %c0_i32 = arith.constant 0 : i32
    %c0_i32_0 = arith.constant 0 : i32
    %c0_i32_1 = arith.constant 0 : i32
    return %c0_i32, %c0_i32_0 : i32, i32
  }
  func.func @transform_2(%arg0: i32) -> (i32, i32) {
    %c0_i32 = arith.constant 0 : i32
    %c0_i32_0 = arith.constant 0 : i32
    %c0_i32_1 = arith.constant 0 : i32
    return %c0_i32, %c0_i32_0 : i32, i32
  }
  func.func @transform_3(%arg0: i32) -> (i32, i32) {
    %c0_i32 = arith.constant 0 : i32
    %c0_i32_0 = arith.constant 0 : i32
    %c0_i32_1 = arith.constant 0 : i32
    return %c0_i32, %c0_i32_0 : i32, i32
  }
  func.func @transform_4(%arg0: i32) -> (i32, i32) {
    %c0_i32 = arith.constant 0 : i32
    %c0_i32_0 = arith.constant 0 : i32
    %c0_i32_1 = arith.constant 0 : i32
    return %c0_i32, %c0_i32_0 : i32, i32
  }
  func.func @transform_5(%arg0: i32) -> (i32, i32, i32) {
    %c0_i32 = arith.constant 0 : i32
    %c0_i32_0 = arith.constant 0 : i32
    %c0_i32_1 = arith.constant 0 : i32
    %c0_i32_2 = arith.constant 0 : i32
    return %c0_i32, %c0_i32_0, %c0_i32_1 : i32, i32, i32
  }
}

</mosaic_0001>

<bundles_post_ra>
// kernel: emnet_up_3d_forward.1
= control target key start
LH: loop header
LB: loop body
LE: loop exit
PB: predicated region body
PF: predicated region fallthrough
CT: control target
= control target key end

     0   :  { %s2695_s18 = smov 0   ;;  %s4018_s0 = inlined_call_operand.vmem [shape: f32[2,32,64], index: 0, kind: input, shape index: {}]   ;;  %s4019_s1 = inlined_call_operand.vmem [shape: bf16[64,1024], index: 1, kind: input, shape index: {}]   ;;  %s4020_s2 = inlined_call_operand.vmem [shape: bf16[272,128], index: 2, kind: input, shape index: {}]   ;;  %s4021_s3 = inlined_call_operand.vmem [shape: bf16[8,32], index: 3, kind: input, shape index: {}]   ;;  %s4022_s4 = inlined_call_operand.vmem [shape: f32[8,128], index: 4, kind: input, shape index: {}]   ;;  %s4023_s5 = inlined_call_operand.vmem [shape: f32[2,8,4096], index: 5, kind: output, shape index: {}]  }
   0x1 LB: > { %s2701_s19 = sadd.s32 4294967295, %s2656_s18   ;;  %p2464_p0 = scmp.ge.s32.totalorder %s2656_s18, 1  ;;  %s2656_s18 = sphi %s2695_s18, %s15_s18  }
   0x2   : > { %p182_p1 = scmp.lt.s32.totalorder %s2656_s18, 3 }
   0x4   : > { %p183_p2 = pnand %p2464_p0, %p182_p1 }
   0x5   : > { %v217_v0 = vld [vmem:[%s4019_s1] sm:$0xff] (!%p183_p2)  ;;  %p205_p3 = scmp.lt.s32.totalorder (!%p183_p2), %s2701_s19, 1  ;;  %v2658_v6 = vmov (!%p183_p2), 0   ;;  %v219_v11 = vld [vmem:[%s4019_s1 + $0x10] sm:$0xff] (!%p183_p2)  ;;  %v218_v26 = vld [vmem:[%s4019_s1 + $0x8] sm:$0xff] (!%p183_p2)  ;;  %vm409_vm0 = vcmask (!%p183_p2), 523264  }
   0x6   : > { %186 = sbr.rel (%p183_p2) target bundleno = 2064 (0x810), region = 40  ;;  %v221_v1 = vld [vmem:[%s4019_s1 + $0x20] sm:$0xff] (!%p183_p2)  ;;  %448 = vmatprep.mubr.bf16.mxu1 (!%p183_p2), %v2658_v6  ;;  %554 = vmatprep.mubr.bf16.mxu0 (!%p183_p2), %v2658_v6  ;;  %v223_v12 = vld [vmem:[%s4019_s1 + $0x30] sm:$0xff] (!%p183_p2)  ;;  %v222_v28 = vld [vmem:[%s4019_s1 + $0x28] sm:$0xff] (!%p183_p2)  ;;  %vm1094_vm1 = vcmask (!%p183_p2), 261120   ;;  %s2611_s10 = sshll.u32 (!%p183_p2), %s2701_s19, 8 }
   0x7   : > { %v225_v2 = vld [vmem:[%s4019_s1 + $0x40] sm:$0xff] (!%p183_p2)  ;;  %v2468_v3 = vcombine.high (!%p183_p2), %v217_v0, %v221_v1  ;;  %v2467_v4 = vcombine.low (!%p183_p2), %v217_v0, %v221_v1  ;;  %2627 = vset.pattern.permute.xlu0 (!%p183_p2), %v2658_v6  ;;  %v2472_v14 = vcombine.high (!%p183_p2), %v219_v11, %v223_v12  ;;  %v2471_v15 = vcombine.low (!%p183_p2), %v219_v11, %v223_v12  ;;  %v227_v16 = vld [vmem:[%s4019_s1 + $0x50] sm:$0xff] (!%p183_p2)  ;;  %v226_v34 = vld [vmem:[%s4019_s1 + $0x48] sm:$0xff] (!%p183_p2)  ;;  %s2965_s13 = scalar_lea.vmem (!%p183_p2), %s4023_s5, %s2611_s10  ;;  %p2542_p4 = scmp.ne.s32.totalorder (!%p183_p2), %s2701_s19, 0 }
   0x8   : > { %v229_v5 = vld [vmem:[%s4019_s1 + $0x60] sm:$0xff] (!%p183_p2)  ;;  %v231_v17 = vld [vmem:[%s4019_s1 + $0x70] sm:$0xff] (!%p183_p2)  ;;  %v230_v35 = vld [vmem:[%s4019_s1 + $0x68] sm:$0xff] (!%p183_p2)  ;;  %v2470_v37 = vcombine.high (!%p183_p2), %v218_v26, %v222_v28  ;;  %v2469_v40 = vcombine.low (!%p183_p2), %v218_v26, %v222_v28 }
   0x9   : > { %v2476_v7 = vcombine.high (!%p183_p2), %v225_v2, %v229_v5  ;;  %v233_v8 = vld [vmem:[%s4019_s1 + $0x80] sm:$0xff] (!%p183_p2)  ;;  %416 = vmatprep.subr.bf16.mxu1 (!%p183_p2), %v2468_v3  ;;  %v2475_v10 = vcombine.low (!%p183_p2), %v225_v2, %v229_v5  ;;  %v2480_v20 = vcombine.high (!%p183_p2), %v227_v16, %v231_v17  ;;  %522 = vmatprep.subr.bf16.mxu0 (!%p183_p2), %v2472_v14  ;;  %v235_v23 = vld [vmem:[%s4019_s1 + $0x90] sm:$0xff] (!%p183_p2)  ;;  %v234_v41 = vld [vmem:[%s4019_s1 + $0x88] sm:$0xff] (!%p183_p2) }
   0xa   : > { %v237_v9 = vld [vmem:[%s4019_s1 + $0xa0] sm:$0xff] (!%p183_p2)  ;;  %417 = vmatpush1.bf16.msra.mxu1 (!%p183_p2), %v2467_v4  ;;  %523 = vmatpush1.bf16.msra.mxu0 (!%p183_p2), %v2471_v15  ;;  %v2479_v22 = vcombine.low (!%p183_p2), %v227_v16, %v231_v17  ;;  %v239_v24 = vld [vmem:[%s4019_s1 + $0xb0] sm:$0xff] (!%p183_p2)  ;;  %v238_v42 = vld [vmem:[%s4019_s1 + $0xa8] sm:$0xff] (!%p183_p2)  ;;  %v2478_v43 = vcombine.high (!%p183_p2), %v226_v34, %v230_v35  ;;  %v2477_v47 = vcombine.low (!%p183_p2), %v226_v34, %v230_v35 }
   0xb   : > { %418 = vmatprep.subr.bf16.mxu1 (!%p183_p2), %v2476_v7  ;;  %v2484_v13 = vcombine.high (!%p183_p2), %v233_v8, %v237_v9  ;;  %v241_v18 = vld [vmem:[%s4019_s1 + $0xc0] sm:$0xff] (!%p183_p2)  ;;  %v2483_v21 = vcombine.low (!%p183_p2), %v233_v8, %v237_v9  ;;  %524 = vmatprep.subr.bf16.mxu0 (!%p183_p2), %v2480_v20  ;;  %v2488_v27 = vcombine.high (!%p183_p2), %v235_v23, %v239_v24  ;;  %v243_v29 = vld [vmem:[%s4019_s1 + $0xd0] sm:$0xff] (!%p183_p2)  ;;  %v242_v48 = vld [vmem:[%s4019_s1 + $0xc8] sm:$0xff] (!%p183_p2) }
   0xc   : > { %v245_v19 = vld [vmem:[%s4019_s1 + $0xe0] sm:$0xff] (!%p183_p2)  ;;  %v247_v30 = vld [vmem:[%s4019_s1 + $0xf0] sm:$0xff] (!%p183_p2)  ;;  %v2487_v36 = vcombine.low (!%p183_p2), %v235_v23, %v239_v24  ;;  %v246_v49 = vld [vmem:[%s4019_s1 + $0xe8] sm:$0xff] (!%p183_p2)  ;;  %v2486_v50 = vcombine.high (!%p183_p2), %v234_v41, %v238_v42  ;;  %v2485_v52 = vcombine.low (!%p183_p2), %v234_v41, %v238_v42 }
   0xd   : > { %s206_s7 = scalar_select %p205_p3, %s2701_s19, 1  ;;  %v2492_v25 = vcombine.high %v241_v18, %v245_v19  ;;  %v2491_v33 = vcombine.low %v241_v18, %v245_v19  ;;  %v2496_v38 = vcombine.high %v243_v29, %v247_v30  ;;  %v2495_v44 = vcombine.low %v243_v29, %v247_v30  ;;  %v220_v54 = vld [vmem:[%s4019_s1 + $0x18] sm:$0xff] }
   0xe   : > { %419 = vmatpush1.bf16.msra.mxu1 %v2475_v10  ;;  %525 = vmatpush1.bf16.msra.mxu0 %v2479_v22  ;;  %v2494_v53 = vcombine.high %v242_v48, %v246_v49  ;;  %v224_v55 = vld [vmem:[%s4019_s1 + $0x38] sm:$0xff]  ;;  %v2493_v56 = vcombine.low %v242_v48, %v246_v49  ;;  %vm1919_vm2 = vcmask (!%p2542_p4), 7168   ;;  %vm1921_vm3 = vcmask (!%p2542_p4), 23560  }
   0xf   : > { %s2610_s12 = sshll.u32 %s206_s7, 5  ;;  %420 = vmatprep.subr.bf16.mxu1 %v2484_v13  ;;  %526 = vmatprep.subr.bf16.mxu0 %v2488_v27  ;;  %v2474_v57 = vcombine.high %v220_v54, %v224_v55  ;;  %v228_v58 = vld [vmem:[%s4019_s1 + $0x58] sm:$0xff]  ;;  %v2473_v60 = vcombine.low %v220_v54, %v224_v55 }
  0x10   : > { %s2749_s25 = scalar_lea.vmem %s4018_s0, %s2610_s12  ;;  %v232_v59 = vld [vmem:[%s4019_s1 + $0x78] sm:$0xff] }
  0x11   : > { %v211_v31 = vld [vmem:[%s2749_s25] sm:$0xff]  ;;  %v212_v32 = vld [vmem:[%s2749_s25 + $0x8] sm:$0xff]  ;;  %v213_v45 = vld [vmem:[%s2749_s25 + $0x10] sm:$0xff]  ;;  %v2482_v61 = vcombine.high %v228_v58, %v232_v59  ;;  %v2481_v0 = vcombine.low %v228_v58, %v232_v59 }
  0x12   : > { %421 = vmatpush1.bf16.msra.mxu1 %v2483_v21  ;;  %v2777_v39 = vpack.c.bf16 %v212_v32, %v211_v31  ;;  %527 = vmatpush1.bf16.msra.mxu0 %v2487_v36  ;;  %v214_v46 = vld [vmem:[%s2749_s25 + $0x18] sm:$0xff]  ;;  %v2630_v58 = vld [vmem:[%s4020_s2 + $0x10] sm:$0xff]  }
  0x13   : > { %422 = vmatprep.subr.bf16.mxu1 %v2492_v25  ;;  %528 = vmatprep.subr.bf16.mxu0 %v2496_v38  ;;  %v216_v51 = vpack.c.bf16 %v214_v46, %v213_v45  ;;  %v236_v62 = vld [vmem:[%s4019_s1 + $0x98] sm:$0xff] }
  0x14   : > { %v240_v63 = vld [vmem:[%s4019_s1 + $0xb8] sm:$0xff] }
  0x15   : > { %v2490_v1 = vcombine.high %v236_v62, %v240_v63  ;;  %v244_v2 = vld [vmem:[%s4019_s1 + $0xd8] sm:$0xff]  ;;  %v2489_v4 = vcombine.low %v236_v62, %v240_v63  ;;  %v2634_v62 = vld [vmem:[%s4020_s2 + $0x30] sm:$0xff]  }
  0x16   : > { %423 = vmatpush1.bf16.msra.mxu1 %v2491_v33  ;;  %529 = vmatpush1.bf16.msra.mxu0 %v2495_v44  ;;  %v248_v3 = vld [vmem:[%s4019_s1 + $0xf8] sm:$0xff] }
  0x17   : > { %469 = vmatprep.subr.bf16.mxu1 %v2470_v37  ;;  %v2498_v5 = vcombine.high %v244_v2, %v248_v3  ;;  %v2497_v7 = vcombine.low %v244_v2, %v248_v3  ;;  %v2631_v59 = vld [vmem:[%s4020_s2 + $0x18] sm:$0xff]   ;;  %v2638_v2 = vld [vmem:[%s4020_s2 + $0x50] sm:$0xff]  }
  0x18   : > { %v2635_v63 = vld [vmem:[%s4020_s2 + $0x38] sm:$0xff]  }
  0x19   : > { %2499 = vmatmul.mubr.msk.bf16.vlgmr.msra.gmra.mrb[0].mxu1 %vm409_vm0, %v2777_v39  ;;  %2503 = vmatmul.mubr.msk.bf16.vlgmr.msra.gmra.mrb[0].mxu0 %vm409_vm0, %v2777_v39  ;;  %v2639_v3 = vld [vmem:[%s4020_s2 + $0x58] sm:$0xff]  }
  0x1a   : > { %470 = vmatpush1.bf16.msra.mxu1 %v2469_v40  ;;  %458 = vmatprep.mubr.bf16.mxu1 %v2658_v6 }
  0x1b   : > { %471 = vmatprep.subr.bf16.mxu1 %v2478_v43  ;;  %564 = vmatprep.mubr.bf16.mxu0 %v2658_v6 }
  0x1e   : > { %472 = vmatpush1.bf16.msra.mxu1 %v2477_v47 }
  0x1f   : > { %473 = vmatprep.subr.bf16.mxu1 %v2486_v50 }
  0x21   : > { %2500 = vmatmul.mubr.msk.bf16.gmra.mrb[4].mxu1 %vm409_vm0, %v216_v51  ;;  %2504 = vmatmul.mubr.msk.bf16.gmra.mrb[4].mxu0 %vm409_vm0, %v216_v51 }
  0x22   : > { %474 = vmatpush1.bf16.msra.mxu1 %v2485_v52  ;;  %501 = vmatprep.mubr.bf16.mxu1 %v2658_v6 }
  0x23   : > { %475 = vmatprep.subr.bf16.mxu1 %v2494_v53  ;;  %844 = vmatprep.mubr.bf16.mxu0 %v2658_v6 }
  0x26   : > { %476 = vmatpush1.bf16.msra.mxu1 %v2493_v56  ;;  %v2628_v56 = vld [vmem:[%s4020_s2] sm:$0xff]  }
  0x27   : > { %575 = vmatprep.subr.bf16.mxu1 %v2474_v57  ;;  %v2629_v57 = vld [vmem:[%s4020_s2 + $0x8] sm:$0xff]  }
  0x29   : > { %2501 = vmatmul.mubr.msk.bf16.vlgmr.msra.gmra.mrb[8].mxu1 %vm409_vm0, %v2777_v39 }
  0x2a   : > { %576 = vmatpush1.bf16.msra.mxu1 %v2473_v60  ;;  %511 = vmatprep.mubr.bf16.mxu1 %v2658_v6  ;;  %v2632_v60 = vld [vmem:[%s4020_s2 + $0x20] sm:$0xff]  }
  0x2b   : > { %577 = vmatprep.subr.bf16.mxu1 %v2482_v61  ;;  %v2633_v61 = vld [vmem:[%s4020_s2 + $0x28] sm:$0xff]  }
  0x2e   : > { %578 = vmatpush1.bf16.msra.mxu1 %v2481_v0  ;;  %v2636_v0 = vld [vmem:[%s4020_s2 + $0x40] sm:$0xff]  }
  0x2f   : > { %579 = vmatprep.subr.bf16.mxu1 %v2490_v1  ;;  %v2637_v1 = vld [vmem:[%s4020_s2 + $0x48] sm:$0xff]  }
  0x31   : > { %2502 = vmatmul.mubr.msk.bf16.gmra.mrb[12].mxu1 %vm409_vm0, %v216_v51 }
  0x32   : > { %580 = vmatpush1.bf16.msra.mxu1 %v2489_v4  ;;  %607 = vmatprep.mubr.bf16.mxu1 %v2658_v6  ;;  %v2640_v4 = vld [vmem:[%s4020_s2 + $0x60] sm:$0xff]  }
  0x33   : > { %581 = vmatprep.subr.bf16.mxu1 %v2498_v5  ;;  %v2641_v5 = vld [vmem:[%s4020_s2 + $0x68] sm:$0xff]  }
  0x36   : > { %582 = vmatpush1.bf16.msra.mxu1 %v2497_v7  ;;  %v2642_v7 = vld [vmem:[%s4020_s2 + $0x70] sm:$0xff]  }
  0x39   : > { %2505 = vmatmul.mubr.msk.bf16.vlgmr.msra.gmra.mrb[16].mxu1 %vm409_vm0, %v2777_v39 }
  0x3a   : > { %617 = vmatprep.mubr.bf16.mxu1 %v2658_v6 }
  0x41   : > { %2506 = vmatmul.mubr.msk.bf16.gmra.mrb[20].mxu1 %vm409_vm0, %v216_v51 }
  0x42   : > { %1130 = vmatprep.mubr.bf16.mxu1 %v2658_v6 }
  0xec   : > { %v450_v8 = vpop.f32.mrb[0].mxu1  ;;  %v556_v14 = vpop.f32.mrb[0].mxu0 }
  0xed   : > { %v452_v9 = vpop.f32.mrb[1].mxu1  ;;  %v558_v15 = vpop.f32.mrb[1].mxu0 }
  0xee   : > { %v454_v10 = vpop.f32.mrb[2].mxu1  ;;  %v560_v16 = vpop.f32.mrb[2].mxu0 }
  0xef   : > { %v628_v11 = vpack.c.bf16 %v454_v10, %v450_v8  ;;  %v456_v12 = vpop.f32.mrb[3].mxu1  ;;  %v644_v18 = vpack.c.bf16 %v560_v16, %v556_v14  ;;  %v562_v19 = vpop.f32.mrb[3].mxu0  ;;  %v2643_v8 = vld [vmem:[%s4020_s2 + $0x78] sm:$0xff]   ;;  %v1084_v10 = vld [vmem:[%s4022_s4] sm:$0xff] }
  0xf0   : > { %v629_v13 = vpack.c.bf16 %v456_v12, %v452_v9  ;;  %v645_v21 = vpack.c.bf16 %v562_v19, %v558_v15  ;;  %v2644_v9 = vld [vmem:[%s4020_s2 + $0x80] sm:$0xff]   ;;  %1087 = vperm.xlu0 %2627, %v1084_v10  }
  0xf2   : > { %812 = vmatprep.subr.bf16.mxu0 %v629_v13 }
  0xf3   : > { %813 = vmatpush1.bf16.msra.mxu0 %v628_v11 }
  0xf4   : > { %v460_v17 = vpop.f32.mrb[4].mxu1  ;;  %v566_v26 = vpop.f32.mrb[4].mxu0 }
  0xf5   : > { %v462_v20 = vpop.f32.mrb[5].mxu1  ;;  %v568_v27 = vpop.f32.mrb[5].mxu0 }
  0xf6   : > { %v464_v22 = vpop.f32.mrb[6].mxu1  ;;  %v570_v28 = vpop.f32.mrb[6].mxu0 }
  0xf7   : > { %v630_v23 = vpack.c.bf16 %v464_v22, %v460_v17  ;;  %v466_v24 = vpop.f32.mrb[7].mxu1  ;;  %v646_v30 = vpack.c.bf16 %v570_v28, %v566_v26  ;;  %v572_v31 = vpop.f32.mrb[7].mxu0 }
  0xf8   : > { %v631_v25 = vpack.c.bf16 %v466_v24, %v462_v20  ;;  %v647_v33 = vpack.c.bf16 %v572_v31, %v568_v27 }
  0xfa   : > { %814 = vmatprep.subr.bf16.mxu0 %v631_v25 }
  0xfb   : > { %815 = vmatpush1.bf16.msra.mxu0 %v630_v23  ;;  %v2910_v23 = vld [vmem:[%s4021_s3] sm:$0xf] }
  0xfc   : > { %v503_v29 = vpop.f32.mrb[8].mxu1 }
  0xfd   : > { %v505_v32 = vpop.f32.mrb[9].mxu1 }
  0xfe   : > { %v507_v34 = vpop.f32.mrb[10].mxu1 }
  0xff   : > { %v636_v35 = vpack.c.bf16 %v507_v34, %v503_v29  ;;  %v509_v36 = vpop.f32.mrb[11].mxu1 }
 0x100   : > { %v637_v37 = vpack.c.bf16 %v509_v36, %v505_v32 }
 0x102   : > { %816 = vmatprep.subr.bf16.mxu0 %v637_v37 }
 0x103   : > { %817 = vmatpush1.bf16.msra.mxu0 %v636_v35 }
 0x104   : > { %v513_v38 = vpop.f32.mrb[12].mxu1 }
 0x105   : > { %v515_v39 = vpop.f32.mrb[13].mxu1 }
 0x106   : > { %v517_v40 = vpop.f32.mrb[14].mxu1 }
 0x107   : > { %v638_v41 = vpack.c.bf16 %v517_v40, %v513_v38  ;;  %v519_v42 = vpop.f32.mrb[15].mxu1 }
 0x108   : > { %v639_v43 = vpack.c.bf16 %v519_v42, %v515_v39 }
 0x10a   : > { %818 = vmatprep.subr.bf16.mxu0 %v639_v43 }
 0x10b   : > { %819 = vmatpush1.bf16.msra.mxu0 %v638_v41 }
 0x10c   : > { %v609_v44 = vpop.f32.mrb[16].mxu1  ;;  %820 = vmatprep.subr.bf16.mxu0 %v645_v21 }
 0x10d   : > { %v611_v45 = vpop.f32.mrb[17].mxu1 }
 0x10e   : > { %v613_v46 = vpop.f32.mrb[18].mxu1 }
 0x10f   : > { %v652_v47 = vpack.c.bf16 %v613_v46, %v609_v44  ;;  %v615_v48 = vpop.f32.mrb[19].mxu1  ;;  %821 = vmatpush1.bf16.msra.mxu0 %v644_v18 }
 0x110   : > { %v653_v49 = vpack.c.bf16 %v615_v48, %v611_v45  ;;  %822 = vmatprep.subr.bf16.mxu0 %v647_v33 }
 0x113   : > { %823 = vmatpush1.bf16.msra.mxu0 %v646_v30 }
 0x114   : > { %v619_v50 = vpop.f32.mrb[20].mxu1  ;;  %824 = vmatprep.subr.bf16.mxu0 %v653_v49 }
 0x115   : > { %v621_v51 = vpop.f32.mrb[21].mxu1 }
 0x116   : > { %v623_v52 = vpop.f32.mrb[22].mxu1 }
 0x117   : > { %v654_v53 = vpack.c.bf16 %v623_v52, %v619_v50  ;;  %v625_v54 = vpop.f32.mrb[23].mxu1  ;;  %825 = vmatpush1.bf16.msra.mxu0 %v652_v47 }
 0x118   : > { %v655_v55 = vpack.c.bf16 %v625_v54, %v621_v51 }
 0x11a   : > { %826 = vmatprep.subr.bf16.mxu0 %v655_v55 }
 0x11b   : > { %827 = vmatpush1.bf16.msra.mxu0 %v654_v53 }
 0x11e   : > { %845 = vmatmul.mubr.bf16.vlgmr.msra.gmra.mrb[8].mxu0 %v2628_v56 }
 0x11f   : > { %854 = vmatprep.mubr.bf16.mxu0 %v2658_v6 }
 0x126   : > { %855 = vmatmul.mubr.bf16.gmra.mrb[12].mxu0 %v2629_v57 }
 0x127   : > { %864 = vmatprep.mubr.bf16.mxu0 %v2658_v6 }
 0x12e   : > { %865 = vmatmul.mubr.bf16.gmra.mrb[16].mxu0 %v2630_v58 }
 0x12f   : > { %874 = vmatprep.mubr.bf16.mxu0 %v2658_v6 }
 0x136   : > { %875 = vmatmul.mubr.bf16.gmra.mrb[20].mxu0 %v2631_v59 }
 0x137   : > { %884 = vmatprep.mubr.bf16.mxu0 %v2658_v6 }
 0x13e   : > { %885 = vmatmul.mubr.bf16.gmra.mrb[24].mxu0 %v2632_v60 }
 0x13f   : > { %894 = vmatprep.mubr.bf16.mxu0 %v2658_v6 }
 0x146   : > { %895 = vmatmul.mubr.bf16.gmra.mrb[28].mxu0 %v2633_v61 }
 0x147   : > { %904 = vmatprep.mubr.bf16.mxu0 %v2658_v6 }
 0x14e   : > { %905 = vmatmul.mubr.bf16.gmra.mrb[32].mxu0 %v2634_v62 }
 0x14f   : > { %914 = vmatprep.mubr.bf16.mxu0 %v2658_v6 }
 0x156   : > { %915 = vmatmul.mubr.bf16.gmra.mrb[36].mxu0 %v2635_v63 }
 0x157   : > { %924 = vmatprep.mubr.bf16.mxu0 %v2658_v6 }
 0x15e   : > { %925 = vmatmul.mubr.bf16.gmra.mrb[40].mxu0 %v2636_v0 }
 0x15f   : > { %934 = vmatprep.mubr.bf16.mxu0 %v2658_v6 }
 0x166   : > { %935 = vmatmul.mubr.bf16.gmra.mrb[44].mxu0 %v2637_v1 }
 0x167   : > { %944 = vmatprep.mubr.bf16.mxu0 %v2658_v6 }
 0x16e   : > { %945 = vmatmul.mubr.bf16.gmra.mrb[48].mxu0 %v2638_v2 }
 0x16f   : > { %954 = vmatprep.mubr.bf16.mxu0 %v2658_v6 }
 0x176   : > { %955 = vmatmul.mubr.bf16.gmra.mrb[52].mxu0 %v2639_v3 }
 0x177   : > { %964 = vmatprep.mubr.bf16.mxu0 %v2658_v6 }
 0x17e   : > { %965 = vmatmul.mubr.bf16.gmra.mrb[56].mxu0 %v2640_v4 }
 0x17f   : > { %974 = vmatprep.mubr.bf16.mxu0 %v2658_v6 }
 0x186   : > { %975 = vmatmul.mubr.bf16.gmra.mrb[60].mxu0 %v2641_v5 }
 0x187   : > { %984 = vmatprep.mubr.bf16.mxu0 %v2658_v6 }
 0x18e   : > { %985 = vmatmul.mubr.bf16.gmra.mrb[64].mxu0 %v2642_v7 }
 0x18f   : > { %994 = vmatprep.mubr.bf16.mxu0 %v2658_v6 }
 0x196   : > { %995 = vmatmul.mubr.bf16.gmra.mrb[68].mxu0 %v2643_v8 }
 0x197   : > { %1004 = vmatprep.mubr.bf16.mxu0 %v2658_v6 }
 0x19e   : > { %1005 = vmatmul.mubr.bf16.gmra.mrb[72].mxu0 %v2644_v9 }
 0x1f1   : > { %v846_v11 = vpop.f32.mrb[8].mxu0 }
 0x1f2   : > { %v848_v12 = vpop.f32.mrb[9].mxu0 }
 0x1f3   : > { %v850_v13 = vpop.f32.mrb[10].mxu0 }
 0x1f4   : > { %v1015_v14 = vpack.c.bf16 %v850_v13, %v846_v11  ;;  %v852_v15 = vpop.f32.mrb[11].mxu0 }
 0x1f5   : > { %v1016_v16 = vpack.c.bf16 %v852_v15, %v848_v12 }
 0x1f7   : > { %1098 = vmatprep.subr.bf16.mxu1 %v1016_v16 }
 0x1f8   : > { %1099 = vmatpush1.bf16.msra.mxu1 %v1015_v14 }
 0x1f9   : > { %v856_v17 = vpop.f32.mrb[12].mxu0 }
 0x1fa   : > { %v858_v18 = vpop.f32.mrb[13].mxu0 }
 0x1fb   : > { %v860_v19 = vpop.f32.mrb[14].mxu0 }
 0x1fc   : > { %v1017_v20 = vpack.c.bf16 %v860_v19, %v856_v17  ;;  %v862_v21 = vpop.f32.mrb[15].mxu0 }
 0x1fd   : > { %v1018_v22 = vpack.c.bf16 %v862_v21, %v858_v18 }
 0x1ff   : > { %1100 = vmatprep.subr.bf16.mxu1 %v1018_v22 }
 0x200   : > { %1101 = vmatpush1.bf16.msra.mxu1 %v1017_v20 }
 0x201   : > { %v866_v24 = vpop.f32.mrb[16].mxu0  ;;  %1148 = vmatprep.subr.bf16.mxu1 %v1018_v22 }
 0x202   : > { %v868_v25 = vpop.f32.mrb[17].mxu0 }
 0x203   : > { %v870_v26 = vpop.f32.mrb[18].mxu0  ;;  %2524 = vmatmul.mubr.msk.bf16.vlgmr.msra.gmra.mrb[24].mxu1 %vm1094_vm1, %v2910_v23 }
 0x204   : > { %v1019_v27 = vpack.c.bf16 %v870_v26, %v866_v24  ;;  %v872_v28 = vpop.f32.mrb[19].mxu0  ;;  %1149 = vmatpush1.bf16.msra.mxu1 %v1017_v20  ;;  %1180 = vmatprep.mubr.bf16.mxu1 %v2658_v6 }
 0x205   : > { %v1020_v29 = vpack.c.bf16 %v872_v28, %v868_v25 }
 0x207   : > { %1150 = vmatprep.subr.bf16.mxu1 %v1020_v29 }
 0x208   : > { %1151 = vmatpush1.bf16.msra.mxu1 %v1019_v27 }
 0x209   : > { %v876_v30 = vpop.f32.mrb[20].mxu0  ;;  %1195 = vmatprep.subr.bf16.mxu1 %v1020_v29 }
 0x20a   : > { %v878_v31 = vpop.f32.mrb[21].mxu0 }
 0x20b   : > { %v880_v32 = vpop.f32.mrb[22].mxu0  ;;  %2527 = vmatmul.mubr.msk.bf16.vlgmr.msra.gmra.mrb[28].mxu1 %vm1094_vm1, %v2910_v23 }
 0x20c   : > { %v1021_v33 = vpack.c.bf16 %v880_v32, %v876_v30  ;;  %v882_v34 = vpop.f32.mrb[23].mxu0  ;;  %1196 = vmatpush1.bf16.msra.mxu1 %v1019_v27  ;;  %1227 = vmatprep.mubr.bf16.mxu1 %v2658_v6 }
 0x20d   : > { %v1022_v35 = vpack.c.bf16 %v882_v34, %v878_v31 }
 0x20f   : > { %1197 = vmatprep.subr.bf16.mxu1 %v1022_v35 }
 0x210   : > { %1198 = vmatpush1.bf16.msra.mxu1 %v1021_v33 }
 0x211   : > { %v886_v36 = vpop.f32.mrb[24].mxu0  ;;  %1242 = vmatprep.subr.bf16.mxu1 %v1022_v35 }
 0x212   : > { %v888_v37 = vpop.f32.mrb[25].mxu0 }
 0x213   : > { %v890_v38 = vpop.f32.mrb[26].mxu0  ;;  %2528 = vmatmul.mubr.msk.bf16.vlgmr.msra.gmra.mrb[32].mxu1 %vm1094_vm1, %v2910_v23 }
 0x214   : > { %v1023_v39 = vpack.c.bf16 %v890_v38, %v886_v36  ;;  %v892_v40 = vpop.f32.mrb[27].mxu0  ;;  %1243 = vmatpush1.bf16.msra.mxu1 %v1021_v33  ;;  %1274 = vmatprep.mubr.bf16.mxu1 %v2658_v6 }
 0x215   : > { %v1024_v41 = vpack.c.bf16 %v892_v40, %v888_v37 }
 0x217   : > { %1244 = vmatprep.subr.bf16.mxu1 %v1024_v41 }
 0x218   : > { %1245 = vmatpush1.bf16.msra.mxu1 %v1023_v39 }
 0x219   : > { %v896_v42 = vpop.f32.mrb[28].mxu0  ;;  %1289 = vmatprep.subr.bf16.mxu1 %v1024_v41 }
 0x21a   : > { %v898_v43 = vpop.f32.mrb[29].mxu0 }
 0x21b   : > { %v900_v44 = vpop.f32.mrb[30].mxu0  ;;  %2529 = vmatmul.mubr.msk.bf16.vlgmr.msra.gmra.mrb[36].mxu1 %vm1094_vm1, %v2910_v23 }
 0x21c   : > { %v1025_v45 = vpack.c.bf16 %v900_v44, %v896_v42  ;;  %v902_v46 = vpop.f32.mrb[31].mxu0  ;;  %1290 = vmatpush1.bf16.msra.mxu1 %v1023_v39  ;;  %1321 = vmatprep.mubr.bf16.mxu1 %v2658_v6 }
 0x21d   : > { %v1026_v47 = vpack.c.bf16 %v902_v46, %v898_v43 }
 0x21f   : > { %1291 = vmatprep.subr.bf16.mxu1 %v1026_v47 }
 0x220   : > { %1292 = vmatpush1.bf16.msra.mxu1 %v1025_v45 }
 0x221   : > { %v906_v48 = vpop.f32.mrb[32].mxu0  ;;  %1336 = vmatprep.subr.bf16.mxu1 %v1026_v47 }
 0x222   : > { %v908_v49 = vpop.f32.mrb[33].mxu0 }
 0x223   : > { %v910_v50 = vpop.f32.mrb[34].mxu0  ;;  %2530 = vmatmul.mubr.msk.bf16.vlgmr.msra.gmra.mrb[40].mxu1 %vm1094_vm1, %v2910_v23 }
 0x224   : > { %v1027_v51 = vpack.c.bf16 %v910_v50, %v906_v48  ;;  %v912_v52 = vpop.f32.mrb[35].mxu0  ;;  %1337 = vmatpush1.bf16.msra.mxu1 %v1025_v45  ;;  %1368 = vmatprep.mubr.bf16.mxu1 %v2658_v6 }
 0x225   : > { %v1028_v53 = vpack.c.bf16 %v912_v52, %v908_v49  ;;  %v2960_v52 = vpop.permute.xlu0 %1087 }
 0x227   : > { %1338 = vmatprep.subr.bf16.mxu1 %v1028_v53 }
 0x228   : > { %1339 = vmatpush1.bf16.msra.mxu1 %v1027_v51 }
 0x229   : > { %v916_v54 = vpop.f32.mrb[36].mxu0  ;;  %1383 = vmatprep.subr.bf16.mxu1 %v1028_v53 }
 0x22a   : > { %v918_v55 = vpop.f32.mrb[37].mxu0 }
 0x22b   : > { %v920_v56 = vpop.f32.mrb[38].mxu0  ;;  %2531 = vmatmul.mubr.msk.bf16.vlgmr.msra.gmra.mrb[44].mxu1 %vm1094_vm1, %v2910_v23 }
 0x22c   : > { %v1029_v57 = vpack.c.bf16 %v920_v56, %v916_v54  ;;  %v922_v58 = vpop.f32.mrb[39].mxu0  ;;  %1384 = vmatpush1.bf16.msra.mxu1 %v1027_v51  ;;  %1415 = vmatprep.mubr.bf16.mxu1 %v2658_v6 }
 0x22d   : > { %v1030_v59 = vpack.c.bf16 %v922_v58, %v918_v55 }
 0x22f   : > { %1385 = vmatprep.subr.bf16.mxu1 %v1030_v59 }
 0x230   : > { %1386 = vmatpush1.bf16.msra.mxu1 %v1029_v57 }
 0x231   : > { %v926_v60 = vpop.f32.mrb[40].mxu0  ;;  %1430 = vmatprep.subr.bf16.mxu1 %v1030_v59 }
 0x232   : > { %v928_v61 = vpop.f32.mrb[41].mxu0 }
 0x233   : > { %v930_v62 = vpop.f32.mrb[42].mxu0  ;;  %2532 = vmatmul.mubr.msk.bf16.vlgmr.msra.gmra.mrb[48].mxu1 %vm1094_vm1, %v2910_v23 }
 0x234   : > { %v1031_v63 = vpack.c.bf16 %v930_v62, %v926_v60  ;;  %v932_v0 = vpop.f32.mrb[43].mxu0  ;;  %1431 = vmatpush1.bf16.msra.mxu1 %v1029_v57  ;;  %1462 = vmatprep.mubr.bf16.mxu1 %v2658_v6 }
 0x235   : > { %v1032_v1 = vpack.c.bf16 %v932_v0, %v928_v61 }
 0x237   : > { %1432 = vmatprep.subr.bf16.mxu1 %v1032_v1 }
 0x238   : > { %1433 = vmatpush1.bf16.msra.mxu1 %v1031_v63 }
 0x239   : > { %v936_v2 = vpop.f32.mrb[44].mxu0  ;;  %1477 = vmatprep.subr.bf16.mxu1 %v1032_v1 }
 0x23a   : > { %v938_v3 = vpop.f32.mrb[45].mxu0 }
 0x23b   : > { %v940_v4 = vpop.f32.mrb[46].mxu0  ;;  %2533 = vmatmul.mubr.msk.bf16.vlgmr.msra.gmra.mrb[52].mxu1 %vm1094_vm1, %v2910_v23 }
 0x23c   : > { %v1033_v5 = vpack.c.bf16 %v940_v4, %v936_v2  ;;  %v942_v7 = vpop.f32.mrb[47].mxu0  ;;  %1478 = vmatpush1.bf16.msra.mxu1 %v1031_v63  ;;  %1509 = vmatprep.mubr.bf16.mxu1 %v2658_v6 }
 0x23d   : > { %v1034_v8 = vpack.c.bf16 %v942_v7, %v938_v3 }
 0x23f   : > { %1479 = vmatprep.subr.bf16.mxu1 %v1034_v8 }
 0x240   : > { %1480 = vmatpush1.bf16.msra.mxu1 %v1033_v5 }
 0x241   : > { %v946_v9 = vpop.f32.mrb[48].mxu0  ;;  %1524 = vmatprep.subr.bf16.mxu1 %v1034_v8 }
 0x242   : > { %v948_v10 = vpop.f32.mrb[49].mxu0 }
 0x243   : > { %v950_v11 = vpop.f32.mrb[50].mxu0  ;;  %2534 = vmatmul.mubr.msk.bf16.vlgmr.msra.gmra.mrb[56].mxu1 %vm1094_vm1, %v2910_v23 }
 0x244   : > { %v1035_v12 = vpack.c.bf16 %v950_v11, %v946_v9  ;;  %v952_v13 = vpop.f32.mrb[51].mxu0  ;;  %1525 = vmatpush1.bf16.msra.mxu1 %v1033_v5  ;;  %1556 = vmatprep.mubr.bf16.mxu1 %v2658_v6 }
 0x245   : > { %v1036_v14 = vpack.c.bf16 %v952_v13, %v948_v10 }
 0x247   : > { %1526 = vmatprep.subr.bf16.mxu1 %v1036_v14 }
 0x248   : > { %1527 = vmatpush1.bf16.msra.mxu1 %v1035_v12 }
 0x249   : > { %v956_v15 = vpop.f32.mrb[52].mxu0  ;;  %1571 = vmatprep.subr.bf16.mxu1 %v1036_v14 }
 0x24a   : > { %v958_v16 = vpop.f32.mrb[53].mxu0 }
 0x24b   : > { %v960_v17 = vpop.f32.mrb[54].mxu0  ;;  %2535 = vmatmul.mubr.msk.bf16.vlgmr.msra.gmra.mrb[60].mxu1 %vm1094_vm1, %v2910_v23 }
 0x24c   : > { %v1037_v18 = vpack.c.bf16 %v960_v17, %v956_v15  ;;  %v962_v19 = vpop.f32.mrb[55].mxu0  ;;  %1572 = vmatpush1.bf16.msra.mxu1 %v1035_v12  ;;  %1603 = vmatprep.mubr.bf16.mxu1 %v2658_v6 }
 0x24d   : > { %v1038_v20 = vpack.c.bf16 %v962_v19, %v958_v16 }
 0x24f   : > { %1573 = vmatprep.subr.bf16.mxu1 %v1038_v20 }
 0x250   : > { %1574 = vmatpush1.bf16.msra.mxu1 %v1037_v18 }
 0x251   : > { %v966_v21 = vpop.f32.mrb[56].mxu0  ;;  %1618 = vmatprep.subr.bf16.mxu1 %v1038_v20 }
 0x252   : > { %v968_v22 = vpop.f32.mrb[57].mxu0 }
 0x253   : > { %v970_v24 = vpop.f32.mrb[58].mxu0  ;;  %2536 = vmatmul.mubr.msk.bf16.vlgmr.msra.gmra.mrb[64].mxu1 %vm1094_vm1, %v2910_v23 }
 0x254   : > { %v1039_v25 = vpack.c.bf16 %v970_v24, %v966_v21  ;;  %v972_v26 = vpop.f32.mrb[59].mxu0  ;;  %1619 = vmatpush1.bf16.msra.mxu1 %v1037_v18  ;;  %1650 = vmatprep.mubr.bf16.mxu1 %v2658_v6 }
 0x255   : > { %v1040_v27 = vpack.c.bf16 %v972_v26, %v968_v22 }
 0x257   : > { %1620 = vmatprep.subr.bf16.mxu1 %v1040_v27 }
 0x258   : > { %1621 = vmatpush1.bf16.msra.mxu1 %v1039_v25 }
 0x259   : > { %v976_v28 = vpop.f32.mrb[60].mxu0  ;;  %1665 = vmatprep.subr.bf16.mxu1 %v1040_v27 }
 0x25a   : > { %v978_v29 = vpop.f32.mrb[61].mxu0 }
 0x25b   : > { %v980_v30 = vpop.f32.mrb[62].mxu0  ;;  %2537 = vmatmul.mubr.msk.bf16.vlgmr.msra.gmra.mrb[68].mxu1 %vm1094_vm1, %v2910_v23 }
 0x25c   : > { %v1041_v31 = vpack.c.bf16 %v980_v30, %v976_v28  ;;  %v982_v32 = vpop.f32.mrb[63].mxu0  ;;  %1666 = vmatpush1.bf16.msra.mxu1 %v1039_v25  ;;  %1697 = vmatprep.mubr.bf16.mxu1 %v2658_v6 }
 0x25d   : > { %v1042_v33 = vpack.c.bf16 %v982_v32, %v978_v29 }
 0x25f   : > { %1667 = vmatprep.subr.bf16.mxu1 %v1042_v33 }
 0x260   : > { %1668 = vmatpush1.bf16.msra.mxu1 %v1041_v31 }
 0x261   : > { %v986_v34 = vpop.f32.mrb[64].mxu0  ;;  %1712 = vmatprep.subr.bf16.mxu1 %v1042_v33 }
 0x262   : > { %v988_v35 = vpop.f32.mrb[65].mxu0 }
 0x263   : > { %v990_v36 = vpop.f32.mrb[66].mxu0  ;;  %2538 = vmatmul.mubr.msk.bf16.vlgmr.msra.gmra.mrb[72].mxu1 %vm1094_vm1, %v2910_v23 }
 0x264   : > { %v1043_v37 = vpack.c.bf16 %v990_v36, %v986_v34  ;;  %v992_v38 = vpop.f32.mrb[67].mxu0  ;;  %1713 = vmatpush1.bf16.msra.mxu1 %v1041_v31  ;;  %1744 = vmatprep.mubr.bf16.mxu1 %v2658_v6 }
 0x265   : > { %v1044_v39 = vpack.c.bf16 %v992_v38, %v988_v35 }
 0x267   : > { %1714 = vmatprep.subr.bf16.mxu1 %v1044_v39 }
 0x268   : > { %1715 = vmatpush1.bf16.msra.mxu1 %v1043_v37 }
 0x269   : > { %v996_v40 = vpop.f32.mrb[68].mxu0  ;;  %1759 = vmatprep.subr.bf16.mxu1 %v1044_v39 }
 0x26a   : > { %v998_v41 = vpop.f32.mrb[69].mxu0 }
 0x26b   : > { %v1000_v42 = vpop.f32.mrb[70].mxu0  ;;  %2539 = vmatmul.mubr.msk.bf16.vlgmr.msra.gmra.mrb[76].mxu1 %vm1094_vm1, %v2910_v23 }
 0x26c   : > { %v1045_v43 = vpack.c.bf16 %v1000_v42, %v996_v40  ;;  %v1002_v44 = vpop.f32.mrb[71].mxu0  ;;  %1760 = vmatpush1.bf16.msra.mxu1 %v1043_v37  ;;  %1791 = vmatprep.mubr.bf16.mxu1 %v2658_v6 }
 0x26d   : > { %v1046_v45 = vpack.c.bf16 %v1002_v44, %v998_v41 }
 0x26f   : > { %1761 = vmatprep.subr.bf16.mxu1 %v1046_v45 }
 0x270   : > { %1762 = vmatpush1.bf16.msra.mxu1 %v1045_v43 }
 0x271   : > { %v1006_v46 = vpop.f32.mrb[72].mxu0  ;;  %1806 = vmatprep.subr.bf16.mxu1 %v1046_v45 }
 0x272   : > { %v1008_v47 = vpop.f32.mrb[73].mxu0 }
 0x273   : > { %v1010_v48 = vpop.f32.mrb[74].mxu0  ;;  %2540 = vmatmul.mubr.msk.bf16.vlgmr.msra.gmra.mrb[80].mxu1 %vm1094_vm1, %v2910_v23 }
 0x274   : > { %v1047_v49 = vpack.c.bf16 %v1010_v48, %v1006_v46  ;;  %v1012_v50 = vpop.f32.mrb[75].mxu0  ;;  %1807 = vmatpush1.bf16.msra.mxu1 %v1045_v43  ;;  %1838 = vmatprep.mubr.bf16.mxu1 %v2658_v6 }
 0x275   : > { %v1048_v51 = vpack.c.bf16 %v1012_v50, %v1008_v47 }
 0x277   : > { %1808 = vmatprep.subr.bf16.mxu1 %v1048_v51 }
 0x278   : > { %1809 = vmatpush1.bf16.msra.mxu1 %v1047_v49 }
 0x27b   : > { %2541 = vmatmul.mubr.msk.bf16.vlgmr.msra.gmra.mrb[84].mxu1 %vm1094_vm1, %v2910_v23 }
 0x2d6   : > { %v1132_v53 = vpop.f32.mrb[24].mxu1 }
 0x2d7   : > { %v1134_v54 = vpop.f32.mrb[25].mxu1  ;;  %v2968_v55 = vadd.f32 %v1132_v53, %v2960_v52 }
 0x2d8   : > { %v1136_v56 = vpop.f32.mrb[26].mxu1  ;;  %v2971_v23 = vadd.f32 %v1134_v54, %v2960_v52 }
 0x2d9   : > { %1142 = vst [vmem:[%s2965_s13] sm:$0xff] %v2968_v55  ;;  %v1137_v57 = vpop.f32.mrb[27].mxu1 }
 0x2da   : > { %1143 = vst [vmem:[%s2965_s13 + $0x8] sm:$0xff] %v2971_v23 }
 0x2de   : > { %v1182_v58 = vpop.f32.mrb[28].mxu1 }
 0x2df   : > { %v2978_v59 = vadd.f32 %v1182_v58, %v2960_v52  ;;  %v1184_v60 = vpop.f32.mrb[29].mxu1 }
 0x2e0   : > { %v2981_v61 = vadd.f32 %v1184_v60, %v2960_v52  ;;  %v1186_v62 = vpop.f32.mrb[30].mxu1 }
 0x2e1   : > { %1189 = vst [vmem:[%s2965_s13 + $0x10] sm:$0xff] %v2978_v59  ;;  %v1187_v63 = vpop.f32.mrb[31].mxu1 }
 0x2e2   : > { %1190 = vst [vmem:[%s2965_s13 + $0x18] sm:$0xff] %v2981_v61 }
 0x2e6   : > { %v1229_v0 = vpop.f32.mrb[32].mxu1 }
 0x2e7   : > { %v2988_v1 = vadd.f32 %v1229_v0, %v2960_v52  ;;  %v1231_v2 = vpop.f32.mrb[33].mxu1 }
 0x2e8   : > { %v2991_v3 = vadd.f32 %v1231_v2, %v2960_v52  ;;  %v1233_v4 = vpop.f32.mrb[34].mxu1 }
 0x2e9   : > { %1236 = vst [vmem:[%s2965_s13 + $0x20] sm:$0xff] %v2988_v1  ;;  %v1234_v5 = vpop.f32.mrb[35].mxu1 }
 0x2ea   : > { %1237 = vst [vmem:[%s2965_s13 + $0x28] sm:$0xff] %v2991_v3 }
 0x2ee   : > { %v1276_v7 = vpop.f32.mrb[36].mxu1 }
 0x2ef   : > { %v2998_v8 = vadd.f32 %v1276_v7, %v2960_v52  ;;  %v1278_v9 = vpop.f32.mrb[37].mxu1 }
 0x2f0   : > { %v3001_v10 = vadd.f32 %v1278_v9, %v2960_v52  ;;  %v1280_v11 = vpop.f32.mrb[38].mxu1 }
 0x2f1   : > { %1283 = vst [vmem:[%s2965_s13 + $0x30] sm:$0xff] %v2998_v8  ;;  %v1281_v12 = vpop.f32.mrb[39].mxu1 }
 0x2f2   : > { %1284 = vst [vmem:[%s2965_s13 + $0x38] sm:$0xff] %v3001_v10 }
 0x2f6   : > { %v1323_v13 = vpop.f32.mrb[40].mxu1 }
 0x2f7   : > { %v3008_v14 = vadd.f32 %v1323_v13, %v2960_v52  ;;  %v1325_v15 = vpop.f32.mrb[41].mxu1 }
 0x2f8   : > { %v3011_v16 = vadd.f32 %v1325_v15, %v2960_v52  ;;  %v1327_v17 = vpop.f32.mrb[42].mxu1 }
 0x2f9   : > { %1330 = vst [vmem:[%s2965_s13 + $0x40] sm:$0xff] %v3008_v14  ;;  %v1328_v18 = vpop.f32.mrb[43].mxu1 }
 0x2fa   : > { %1331 = vst [vmem:[%s2965_s13 + $0x48] sm:$0xff] %v3011_v16 }
 0x2fe   : > { %v1370_v19 = vpop.f32.mrb[44].mxu1 }
 0x2ff   : > { %v3018_v20 = vadd.f32 %v1370_v19, %v2960_v52  ;;  %v1372_v21 = vpop.f32.mrb[45].mxu1 }
 0x300   : > { %v3021_v22 = vadd.f32 %v1372_v21, %v2960_v52  ;;  %v1374_v24 = vpop.f32.mrb[46].mxu1 }
 0x301   : > { %1377 = vst [vmem:[%s2965_s13 + $0x50] sm:$0xff] %v3018_v20  ;;  %v1375_v25 = vpop.f32.mrb[47].mxu1 }
 0x302   : > { %1378 = vst [vmem:[%s2965_s13 + $0x58] sm:$0xff] %v3021_v22 }
 0x306   : > { %v1417_v26 = vpop.f32.mrb[48].mxu1 }
 0x307   : > { %v3028_v27 = vadd.f32 %v1417_v26, %v2960_v52  ;;  %v1419_v28 = vpop.f32.mrb[49].mxu1 }
 0x308   : > { %v3031_v29 = vadd.f32 %v1419_v28, %v2960_v52  ;;  %v1421_v30 = vpop.f32.mrb[50].mxu1 }
 0x309   : > { %1424 = vst [vmem:[%s2965_s13 + $0x60] sm:$0xff] %v3028_v27  ;;  %v1422_v31 = vpop.f32.mrb[51].mxu1 }
 0x30a   : > { %1425 = vst [vmem:[%s2965_s13 + $0x68] sm:$0xff] %v3031_v29 }
 0x30e   : > { %v1464_v32 = vpop.f32.mrb[52].mxu1 }
 0x30f   : > { %v3038_v33 = vadd.f32 %v1464_v32, %v2960_v52  ;;  %v1466_v34 = vpop.f32.mrb[53].mxu1 }
 0x310   : > { %v3041_v35 = vadd.f32 %v1466_v34, %v2960_v52  ;;  %v1468_v36 = vpop.f32.mrb[54].mxu1 }
 0x311   : > { %1471 = vst [vmem:[%s2965_s13 + $0x70] sm:$0xff] %v3038_v33  ;;  %v1469_v37 = vpop.f32.mrb[55].mxu1 }
 0x312   : > { %1472 = vst [vmem:[%s2965_s13 + $0x78] sm:$0xff] %v3041_v35 }
 0x316   : > { %v1511_v38 = vpop.f32.mrb[56].mxu1 }
 0x317   : > { %v3048_v39 = vadd.f32 %v1511_v38, %v2960_v52  ;;  %v1513_v40 = vpop.f32.mrb[57].mxu1 }
 0x318   : > { %v3051_v41 = vadd.f32 %v1513_v40, %v2960_v52  ;;  %v1515_v42 = vpop.f32.mrb[58].mxu1 }
 0x319   : > { %1518 = vst [vmem:[%s2965_s13 + $0x80] sm:$0xff] %v3048_v39  ;;  %v1516_v43 = vpop.f32.mrb[59].mxu1  ;;  %v1885_v42 = vadd.f32 (!%p2542_p4), %v2971_v23, %v2968_v55 }
 0x31a   : > { %1519 = vst [vmem:[%s2965_s13 + $0x88] sm:$0xff] %v3051_v41 }
 0x31b   : > { %v1886_v43 = vadd.f32 (!%p2542_p4), %v1885_v42, %v2978_v59 }
 0x31e   : > { %v1558_v44 = vpop.f32.mrb[60].mxu1 }
 0x31f   : > { %v3058_v45 = vadd.f32 %v1558_v44, %v2960_v52  ;;  %v1560_v46 = vpop.f32.mrb[61].mxu1  ;;  %v1887_v44 = vadd.f32 (!%p2542_p4), %v1886_v43, %v2981_v61 }
 0x320   : > { %v3061_v47 = vadd.f32 %v1560_v46, %v2960_v52  ;;  %v1562_v48 = vpop.f32.mrb[62].mxu1 }
 0x321   : > { %1565 = vst [vmem:[%s2965_s13 + $0x90] sm:$0xff] %v3058_v45  ;;  %v1563_v49 = vpop.f32.mrb[63].mxu1  ;;  %v1888_v46 = vadd.f32 (!%p2542_p4), %v1887_v44, %v2988_v1  ;;  %v2659_v44 = vmov (!%p2542_p4), 0.0  }
 0x322   : > { %1566 = vst [vmem:[%s2965_s13 + $0x98] sm:$0xff] %v3061_v47 }
 0x326   : > { %v1605_v50 = vpop.f32.mrb[64].mxu1 }
 0x327   : > { %v3068_v51 = vadd.f32 %v1605_v50, %v2960_v52  ;;  %v1607_v53 = vpop.f32.mrb[65].mxu1 }
 0x328   : > { %v3071_v54 = vadd.f32 %v1607_v53, %v2960_v52  ;;  %v1609_v56 = vpop.f32.mrb[66].mxu1 }
 0x329   : > { %1612 = vst [vmem:[%s2965_s13 + $0xa0] sm:$0xff] %v3068_v51  ;;  %v1610_v57 = vpop.f32.mrb[67].mxu1 }
 0x32a   : > { %1613 = vst [vmem:[%s2965_s13 + $0xa8] sm:$0xff] %v3071_v54 }
 0x32e   : > { %v1652_v58 = vpop.f32.mrb[68].mxu1 }
 0x32f   : > { %v3078_v60 = vadd.f32 %v1652_v58, %v2960_v52  ;;  %v1654_v62 = vpop.f32.mrb[69].mxu1 }
 0x330   : > { %v3081_v63 = vadd.f32 %v1654_v62, %v2960_v52  ;;  %v1656_v0 = vpop.f32.mrb[70].mxu1 }
 0x331   : > { %1659 = vst [vmem:[%s2965_s13 + $0xb0] sm:$0xff] %v3078_v60  ;;  %v1657_v2 = vpop.f32.mrb[71].mxu1 }
 0x332   : > { %1660 = vst [vmem:[%s2965_s13 + $0xb8] sm:$0xff] %v3081_v63 }
 0x336   : > { %v1699_v4 = vpop.f32.mrb[72].mxu1 }
 0x337   : > { %v3088_v5 = vadd.f32 %v1699_v4, %v2960_v52  ;;  %v1701_v7 = vpop.f32.mrb[73].mxu1 }
 0x338   : > { %v3091_v9 = vadd.f32 %v1701_v7, %v2960_v52  ;;  %v1703_v11 = vpop.f32.mrb[74].mxu1 }
 0x339   : > { %1706 = vst [vmem:[%s2965_s13 + $0xc0] sm:$0xff] %v3088_v5  ;;  %v1704_v12 = vpop.f32.mrb[75].mxu1 }
 0x33a   : > { %1707 = vst [vmem:[%s2965_s13 + $0xc8] sm:$0xff] %v3091_v9 }
 0x33e   : > { %v1746_v13 = vpop.f32.mrb[76].mxu1 }
 0x33f   : > { %v3098_v15 = vadd.f32 %v1746_v13, %v2960_v52  ;;  %v1748_v17 = vpop.f32.mrb[77].mxu1 }
 0x340   : > { %v3101_v18 = vadd.f32 %v1748_v17, %v2960_v52  ;;  %v1750_v19 = vpop.f32.mrb[78].mxu1 }
 0x341   : > { %1753 = vst [vmem:[%s2965_s13 + $0xd0] sm:$0xff] %v3098_v15  ;;  %v1751_v21 = vpop.f32.mrb[79].mxu1 }
 0x342   : > { %1754 = vst [vmem:[%s2965_s13 + $0xd8] sm:$0xff] %v3101_v18 }
 0x346   : > { %v1793_v24 = vpop.f32.mrb[80].mxu1 }
 0x347   : > { %v3108_v25 = vadd.f32 %v1793_v24, %v2960_v52  ;;  %v1795_v26 = vpop.f32.mrb[81].mxu1 }
 0x348   : > { %v3111_v28 = vadd.f32 %v1795_v26, %v2960_v52  ;;  %v1797_v30 = vpop.f32.mrb[82].mxu1 }
 0x349   : > { %1800 = vst [vmem:[%s2965_s13 + $0xe0] sm:$0xff] %v3108_v25  ;;  %v1798_v31 = vpop.f32.mrb[83].mxu1 }
 0x34a   : > { %1801 = vst [vmem:[%s2965_s13 + $0xe8] sm:$0xff] %v3111_v28 }
 0x34c   : > { %1884 = sbr.rel (%p2542_p4) target bundleno = 1048 (0x418), region = 44 }
 0x34e   : > { %v1840_v32 = vpop.f32.mrb[84].mxu1 }
 0x34f   : > { %v3118_v34 = vadd.f32 %v1840_v32, %v2960_v52  ;;  %v1842_v36 = vpop.f32.mrb[85].mxu1 }
 0x350   : > { %v3121_v37 = vadd.f32 %v1842_v36, %v2960_v52  ;;  %v1844_v38 = vpop.f32.mrb[86].mxu1  ;;  %v1889_v52 = vadd.f32 (!%p2542_p4), %v1888_v46, %v2991_v3 }
 0x351   : > { %1847 = vst [vmem:[%s2965_s13 + $0xf0] sm:$0xff] %v3118_v34  ;;  %v1845_v40 = vpop.f32.mrb[87].mxu1 }
 0x352   : > { %1848 = vst [vmem:[%s2965_s13 + $0xf8] sm:$0xff] %v3121_v37  ;;  %v1890_v48 = vadd.f32 (!%p2542_p4), %v1889_v52, %v2998_v8 }
 0x354   : > { %v1891_v49 = vadd.f32 %v1890_v48, %v3001_v10 }
 0x356   : > { %v1892_v50 = vadd.f32 %v1891_v49, %v3008_v14 }
 0x358   : > { %v1893_v53 = vadd.f32 %v1892_v50, %v3011_v16 }
 0x35a   : > { %v1894_v56 = vadd.f32 %v1893_v53, %v3018_v20 }
 0x35c   : > { %v1895_v57 = vadd.f32 %v1894_v56, %v3021_v22 }
 0x35e   : > { %v1896_v58 = vadd.f32 %v1895_v57, %v3028_v27 }
 0x360   : > { %v1897_v62 = vadd.f32 %v1896_v58, %v3031_v29 }
 0x362   : > { %v1898_v0 = vadd.f32 %v1897_v62, %v3038_v33 }
 0x364   : > { %v1899_v2 = vadd.f32 %v1898_v0, %v3041_v35 }
 0x366   : > { %v1900_v4 = vadd.f32 %v1899_v2, %v3048_v39 }
 0x368   : > { %v1901_v7 = vadd.f32 %v1900_v4, %v3051_v41 }
 0x36a   : > { %v1902_v11 = vadd.f32 %v1901_v7, %v3058_v45 }
 0x36c   : > { %v1903_v12 = vadd.f32 %v1902_v11, %v3061_v47 }
 0x36e   : > { %v1904_v13 = vadd.f32 %v1903_v12, %v3068_v51 }
 0x370   : > { %v1905_v17 = vadd.f32 %v1904_v13, %v3071_v54 }
 0x372   : > { %v1906_v19 = vadd.f32 %v1905_v17, %v3078_v60 }
 0x374   : > { %v1907_v21 = vadd.f32 %v1906_v19, %v3081_v63 }
 0x376   : > { %v1908_v24 = vadd.f32 %v1907_v21, %v3088_v5 }
 0x378   : > { %v1909_v26 = vadd.f32 %v1908_v24, %v3091_v9 }
 0x37a   : > { %v1910_v30 = vadd.f32 %v1909_v26, %v3098_v15 }
 0x37c   : > { %v1911_v31 = vadd.f32 %v1910_v30, %v3101_v18 }
 0x37e   : > { %v1912_v32 = vadd.f32 %v1911_v31, %v3108_v25 }
 0x380   : > { %v1913_v36 = vadd.f32 %v1912_v32, %v3111_v28 }
 0x382   : > { %v1914_v38 = vadd.f32 %v1913_v36, %v3118_v34 }
 0x384   : > { %v1915_v40 = vadd.f32 %v1914_v38, %v3121_v37 }
 0x386   : > { %1916 = vadd.xlane.f32.xlu0 %v1915_v40 }
 0x413   : > { %v1917_v42 = vpop.xlane.xlu0 %1916 }
 0x414   : > { %v1918_v43 = vmul.f32 0.00024414063, %v1917_v42 }
 0x416   : > { %1920 = vst.msk [vmem:[#allocation4] sm:$0xff] %vm1919_vm2, %v1918_v43 }
 0x417   : > { %1922 = vst.msk [vmem:[#allocation4] sm:$0xff] %vm1921_vm3, %v2659_v44 }
 0x418 PF: > { %2645 = vset.pattern.permute.xlu0 %v2658_v6  ;;  %vm1995_vm4 = vcmask 15368   ;;  %vm2064_vm5 = vcmask 23568   ;;  %p2543_p5 = scmp.ne.s32.totalorder %s2701_s19, 1 }
 0x41e   : > { %v3161_v46 = vld [vmem:[#allocation4] sm:$0xff] }
 0x41f   : > { %1926 = vperm.xlu0 %2645, %v3161_v46  }
 0x49e   : > { %v3164_v52 = vpop.permute.xlu0 %1926 }
 0x49f   : > { %v1929_v48 = vsub.f32 %v2968_v55, %v3164_v52  ;;  %v1930_v49 = vsub.f32 %v2971_v23, %v3164_v52  ;;  %v1931_v50 = vsub.f32 %v2978_v59, %v3164_v52  ;;  %v1932_v56 = vsub.f32 %v2981_v61, %v3164_v52 }
 0x4a0   : > { %v1933_v57 = vsub.f32 %v2988_v1, %v3164_v52  ;;  %v1934_v55 = vsub.f32 %v2991_v3, %v3164_v52  ;;  %v1935_v23 = vsub.f32 %v2998_v8, %v3164_v52  ;;  %v1936_v61 = vsub.f32 %v3001_v10, %v3164_v52 }
 0x4a1   : > { %v1961_v53 = vadd.f32 %v1930_v49, %v1929_v48  ;;  %v1998_v62 = vmul.f32 %v1929_v48, %v1929_v48  ;;  %v1999_v0 = vmul.f32 %v1930_v49, %v1930_v49  ;;  %v2000_v59 = vmul.f32 %v1931_v50, %v1931_v50 }
 0x4a2   : > { %v2001_v12 = vmul.f32 %v1932_v56, %v1932_v56  ;;  %v1937_v1 = vsub.f32 %v3008_v14, %v3164_v52  ;;  %v2002_v19 = vmul.f32 %v1933_v57, %v1933_v57  ;;  %v1938_v3 = vsub.f32 %v3011_v16, %v3164_v52 }
 0x4a3   : > { %v1962_v6 = vadd.f32 %v1961_v53, %v1931_v50  ;;  %v2030_v7 = vadd.f32 %v1999_v0, %v1998_v62  ;;  %v2003_v8 = vmul.f32 %v1934_v55, %v1934_v55  ;;  %v1939_v30 = vsub.f32 %v3018_v20, %v3164_v52 }
 0x4a4   : > { %v2004_v10 = vmul.f32 %v1935_v23, %v1935_v23  ;;  %v1940_v36 = vsub.f32 %v3021_v22, %v3164_v52  ;;  %v2005_v14 = vmul.f32 %v1936_v61, %v1936_v61  ;;  %v1941_v42 = vsub.f32 %v3028_v27, %v3164_v52 }
 0x4a5   : > { %v1963_v58 = vadd.f32 %v1962_v6, %v1932_v56  ;;  %v2031_v13 = vadd.f32 %v2030_v7, %v2000_v59  ;;  %v2006_v16 = vmul.f32 %v1937_v1, %v1937_v1  ;;  %v1942_v48 = vsub.f32 %v3031_v29, %v3164_v52 }
 0x4a6   : > { %v2007_v20 = vmul.f32 %v1938_v3, %v1938_v3  ;;  %v1943_v53 = vsub.f32 %v3038_v33, %v3164_v52  ;;  %v2008_v22 = vmul.f32 %v1939_v30, %v1939_v30  ;;  %v2009_v27 = vmul.f32 %v1940_v36, %v1940_v36 }
 0x4a7   : > { %v1964_v2 = vadd.f32 %v1963_v58, %v1933_v57  ;;  %v2032_v21 = vadd.f32 %v2031_v13, %v2001_v12  ;;  %v1944_v57 = vsub.f32 %v3041_v35, %v3164_v52  ;;  %v1945_v0 = vsub.f32 %v3048_v39, %v3164_v52 }
 0x4a8   : > { %v2010_v29 = vmul.f32 %v1941_v42, %v1941_v42  ;;  %v2011_v33 = vmul.f32 %v1942_v48, %v1942_v48  ;;  %v1947_v7 = vsub.f32 %v3058_v45, %v3164_v52  ;;  %v2012_v35 = vmul.f32 %v1943_v53, %v1943_v53 }
 0x4a9   : > { %v1965_v4 = vadd.f32 %v1964_v2, %v1934_v55  ;;  %v2033_v26 = vadd.f32 %v2032_v21, %v2002_v19  ;;  %v1948_v12 = vsub.f32 %v3061_v47, %v3164_v52  ;;  %v2013_v39 = vmul.f32 %v1944_v57, %v1944_v57 }
 0x4aa   : > { %v2016_v47 = vmul.f32 %v1947_v7, %v1947_v7 }
 0x4ab   : > { %v1966_v11 = vadd.f32 %v1965_v4, %v1935_v23  ;;  %v2034_v32 = vadd.f32 %v2033_v26, %v2003_v8  ;;  %v1946_v23 = vsub.f32 %v3051_v41, %v3164_v52  ;;  %v2014_v41 = vmul.f32 %v1945_v0, %v1945_v0 }
 0x4ac   : > { %v1951_v26 = vsub.f32 %v3078_v60, %v3164_v52 }
 0x4ad   : > { %v1967_v17 = vadd.f32 %v1966_v11, %v1936_v61  ;;  %v2035_v40 = vadd.f32 %v2034_v32, %v2004_v10  ;;  %v2015_v45 = vmul.f32 %v1946_v23, %v1946_v23  ;;  %v1952_v10 = vsub.f32 %v3081_v63, %v3164_v52 }
 0x4ae   : > { %v2020_v63 = vmul.f32 %v1951_v26, %v1951_v26 }
 0x4af   : > { %v1968_v24 = vadd.f32 %v1967_v17, %v1937_v1  ;;  %v2036_v44 = vadd.f32 %v2035_v40, %v2005_v14  ;;  %v1949_v17 = vsub.f32 %v3068_v51, %v3164_v52  ;;  %v2017_v51 = vmul.f32 %v1948_v12, %v1948_v12 }
 0x4b1   : > { %v1969_v31 = vadd.f32 %v1968_v24, %v1938_v3  ;;  %v2037_v50 = vadd.f32 %v2036_v44, %v2006_v16  ;;  %v1950_v3 = vsub.f32 %v3071_v54, %v3164_v52  ;;  %v2018_v54 = vmul.f32 %v1949_v17, %v1949_v17 }
 0x4b2   : > { %v1955_v44 = vsub.f32 %v3098_v15, %v3164_v52 }
 0x4b3   : > { %v1970_v38 = vadd.f32 %v1969_v31, %v1939_v30  ;;  %v2038_v6 = vadd.f32 %v2037_v50, %v2007_v20  ;;  %v2019_v60 = vmul.f32 %v1950_v3, %v1950_v3  ;;  %v1956_v20 = vsub.f32 %v3101_v18, %v3164_v52 }
 0x4b4   : > { %v2024_v18 = vmul.f32 %v1955_v44, %v1955_v44 }
 0x4b5   : > { %v1971_v43 = vadd.f32 %v1970_v38, %v1940_v36  ;;  %v2039_v62 = vadd.f32 %v2038_v6, %v2008_v22  ;;  %v1953_v38 = vsub.f32 %v3088_v5, %v3164_v52  ;;  %v2021_v5 = vmul.f32 %v1952_v10, %v1952_v10 }
 0x4b7   : > { %v1972_v49 = vadd.f32 %v1971_v43, %v1941_v42  ;;  %v2040_v2 = vadd.f32 %v2039_v62, %v2009_v27  ;;  %v1954_v42 = vsub.f32 %v3091_v9, %v3164_v52  ;;  %v2022_v9 = vmul.f32 %v1953_v38, %v1953_v38 }
 0x4b8   : > { %v1959_v62 = vsub.f32 %v3118_v34, %v3164_v52 }
 0x4b9   : > { %v1973_v56 = vadd.f32 %v1972_v49, %v1942_v48  ;;  %v2041_v59 = vadd.f32 %v2040_v2, %v2010_v29  ;;  %v2023_v15 = vmul.f32 %v1954_v42, %v1954_v42  ;;  %v1960_v29 = vsub.f32 %v3121_v37, %v3164_v52 }
 0x4bb   : > { %v1974_v58 = vadd.f32 %v1973_v56, %v1943_v53  ;;  %v2042_v11 = vadd.f32 %v2041_v59, %v2011_v33  ;;  %v1957_v56 = vsub.f32 %v3108_v25, %v3164_v52  ;;  %v2025_v25 = vmul.f32 %v1956_v20, %v1956_v20 }
 0x4bd   : > { %v1975_v55 = vadd.f32 %v1974_v58, %v1944_v57  ;;  %v2043_v1 = vadd.f32 %v2042_v11, %v2012_v35  ;;  %v1958_v57 = vsub.f32 %v3111_v28, %v3164_v52  ;;  %v2026_v33 = vmul.f32 %v1957_v56, %v1957_v56 }
 0x4be   : > { %v2029_v11 = vmul.f32 %v1960_v29, %v1960_v29 }
 0x4bf   : > { %v1976_v4 = vadd.f32 %v1975_v55, %v1945_v0  ;;  %v2044_v21 = vadd.f32 %v2043_v1, %v2013_v39  ;;  %v2027_v28 = vmul.f32 %v1958_v57, %v1958_v57 }
 0x4c1   : > { %v1977_v61 = vadd.f32 %v1976_v4, %v1946_v23  ;;  %v2045_v8 = vadd.f32 %v2044_v21, %v2014_v41 }
 0x4c3   : > { %v1978_v13 = vadd.f32 %v1977_v61, %v1947_v7  ;;  %v2046_v31 = vadd.f32 %v2045_v8, %v2015_v45  ;;  %v2028_v61 = vmul.f32 %v1959_v62, %v1959_v62 }
 0x4c5   : > { %v1979_v19 = vadd.f32 %v1978_v13, %v1948_v12  ;;  %v2047_v36 = vadd.f32 %v2046_v31, %v2016_v47 }
 0x4c7   : > { %v1980_v24 = vadd.f32 %v1979_v19, %v1949_v17  ;;  %v2048_v40 = vadd.f32 %v2047_v36, %v2017_v51 }
 0x4c9   : > { %v1981_v30 = vadd.f32 %v1980_v24, %v1950_v3  ;;  %v2049_v16 = vadd.f32 %v2048_v40, %v2018_v54 }
 0x4cb   : > { %v1982_v32 = vadd.f32 %v1981_v30, %v1951_v26  ;;  %v2050_v49 = vadd.f32 %v2049_v16, %v2019_v60 }
 0x4cd   : > { %v1983_v14 = vadd.f32 %v1982_v32, %v1952_v10  ;;  %v2051_v53 = vadd.f32 %v2050_v49, %v2020_v63 }
 0x4cf   : > { %v1984_v43 = vadd.f32 %v1983_v14, %v1953_v38  ;;  %v2052_v6 = vadd.f32 %v2051_v53, %v2021_v5 }
 0x4d1   : > { %v1985_v48 = vadd.f32 %v1984_v43, %v1954_v42  ;;  %v2053_v27 = vadd.f32 %v2052_v6, %v2022_v9 }
 0x4d3   : > { %v1986_v50 = vadd.f32 %v1985_v48, %v1955_v44  ;;  %v2054_v55 = vadd.f32 %v2053_v27, %v2023_v15 }
 0x4d5   : > { %v1987_v22 = vadd.f32 %v1986_v50, %v1956_v20  ;;  %v2055_v23 = vadd.f32 %v2054_v55, %v2024_v18 }
 0x4d7   : > { %v1988_v58 = vadd.f32 %v1987_v22, %v1957_v56  ;;  %v2056_v59 = vadd.f32 %v2055_v23, %v2025_v25 }
 0x4d9   : > { %v1989_v0 = vadd.f32 %v1988_v58, %v1958_v57  ;;  %v2057_v7 = vadd.f32 %v2056_v59, %v2026_v33 }
 0x4db   : > { %v1990_v2 = vadd.f32 %v1989_v0, %v1959_v62  ;;  %v2058_v35 = vadd.f32 %v2057_v7, %v2027_v28 }
 0x4dd   : > { %v1991_v4 = vadd.f32 %v1990_v2, %v1960_v29  ;;  %v2059_v12 = vadd.f32 %v2058_v35, %v2028_v61 }
 0x4df   : > { %1992 = vadd.xlane.f32.xlu0 %v1991_v4  ;;  %v2060_v34 = vadd.f32 %v2059_v12, %v2029_v11 }
 0x4e1   : > { %2061 = vadd.xlane.f32.xlu1 %v2060_v34 }
 0x56c   : > { %v1993_v13 = vpop.xlane.xlu0 %1992 }
 0x56d   : > { %v1994_v39 = vadd.f32 %v1993_v13, %v3161_v46 }
 0x56e   : > { %v2062_v37 = vpop.xlane.xlu1 %2061 }
 0x56f   : > { %1996 = vst.msk [vmem:[#allocation4] sm:$0xff] %vm1995_vm4, %v1994_v39 }
 0x573   : > { %2069 = sbr.rel (%p2543_p5) target bundleno = 2064 (0x810), region = 48 }
 0x576   : > { %v1997_v52 = vld [vmem:[#allocation4] sm:$0xff] }
 0x577   : > { %v2063_v1 = vadd.f32 %v2062_v37, %v1997_v52 }
 0x579   : > { %2065 = vst.msk [vmem:[#allocation4] sm:$0xff] %vm2064_vm5, %v2063_v1 }
 0x57a   : > { %s2660_s14 = smov 127   ;;  %s2661_s15 = smov 1   ;;  %v2662_v46 = vmov 1   ;;  %v2083_v8 = vld [vmem:[%s4022_s4] sm:$0xff]  ;;  %v2663_v47 = vmov 2   ;;  %v2111_v54 = vld [vmem:[%s4023_s5 + $0x8] sm:$0xff] }
 0x57b   : > { %2646 = vset.pattern.permute.xlu1 %v2662_v46  ;;  %2647 = vset.pattern.permute.xlu0 %v2663_v47  ;;  %s2664_s19 = smov 2   ;;  %v2110_v14 = vld [vmem:[%s4023_s5] sm:$0xff]  ;;  %v2112_v40 = vld [vmem:[%s4023_s5 + $0x10] sm:$0xff]  ;;  %v2113_v42 = vld [vmem:[%s4023_s5 + $0x18] sm:$0xff] }
 0x57c   : > { %v2114_v43 = vld [vmem:[%s4023_s5 + $0x20] sm:$0xff]  ;;  %v2115_v60 = vld [vmem:[%s4023_s5 + $0x28] sm:$0xff]  ;;  %v2116_v16 = vld [vmem:[%s4023_s5 + $0x30] sm:$0xff] }
 0x57d   : > { %v2117_v44 = vld [vmem:[%s4023_s5 + $0x38] sm:$0xff]  ;;  %v2118_v48 = vld [vmem:[%s4023_s5 + $0x40] sm:$0xff]  ;;  %v2119_v63 = vld [vmem:[%s4023_s5 + $0x48] sm:$0xff] }
 0x57e   : > { %v2120_v49 = vld [vmem:[%s4023_s5 + $0x50] sm:$0xff]  ;;  %v2121_v20 = vld [vmem:[%s4023_s5 + $0x58] sm:$0xff]  ;;  %v2122_v5 = vld [vmem:[%s4023_s5 + $0x60] sm:$0xff] }
 0x57f   : > { %v2123_v53 = vld [vmem:[%s4023_s5 + $0x68] sm:$0xff]  ;;  %v2124_v56 = vld [vmem:[%s4023_s5 + $0x70] sm:$0xff]  ;;  %v2125_v22 = vld [vmem:[%s4023_s5 + $0x78] sm:$0xff] }
 0x580   : > { %v2070_v17 = vld [vmem:[#allocation4] sm:$0xff]  ;;  %v2127_v6 = vld [vmem:[%s4023_s5 + $0x88] sm:$0xff]  ;;  %v2128_v57 = vld [vmem:[%s4023_s5 + $0x90] sm:$0xff] }
 0x581   : > { %v2071_v19 = vmul.f32 0.00012207031, %v2070_v17  ;;  %v2126_v9 = vld [vmem:[%s4023_s5 + $0x80] sm:$0xff]  ;;  %v2129_v58 = vld [vmem:[%s4023_s5 + $0x98] sm:$0xff]  ;;  %v2131_v27 = vld [vmem:[%s4023_s5 + $0xa8] sm:$0xff] }
 0x582   : > { %v2130_v15 = vld [vmem:[%s4023_s5 + $0xa0] sm:$0xff]  ;;  %v2132_v62 = vld [vmem:[%s4023_s5 + $0xb0] sm:$0xff]  ;;  %v2133_v0 = vld [vmem:[%s4023_s5 + $0xb8] sm:$0xff] }
 0x583   : > { %v2077_v41 = vmul.f32 %v2071_v19, %v2071_v19  ;;  %2073 = vrot.lane.b32.xlu1 %v2071_v19, %s2660_s14  ;;  %v2134_v25 = vld [vmem:[%s4023_s5 + $0xc0] sm:$0xff]  ;;  %v2135_v23 = vld [vmem:[%s4023_s5 + $0xc8] sm:$0xff]  ;;  %v2136_v4 = vld [vmem:[%s4023_s5 + $0xd0] sm:$0xff] }
 0x584   : > { %v2137_v33 = vld [vmem:[%s4023_s5 + $0xd8] sm:$0xff]  ;;  %v2138_v35 = vld [vmem:[%s4023_s5 + $0xe0] sm:$0xff]  ;;  %v2139_v11 = vld [vmem:[%s4023_s5 + $0xe8] sm:$0xff] }
 0x585   : > { %2079 = vrot.lane.b32.xlu0 %v2077_v41, %s2661_s15  ;;  %v2140_v12 = vld [vmem:[%s4023_s5 + $0xf0] sm:$0xff]  ;;  %v2141_v34 = vld [vmem:[%s4023_s5 + $0xf8] sm:$0xff]  ;;  %v2544_v1 = vld [vmem:[%s4023_s5 + $0x100] sm:$0xff] }
 0x586   : > { %v2547_v41 = vld [vmem:[%s4023_s5 + $0x118] sm:$0xff] }
 0x5f5   : > { %v2074_v31 = vpop.permute.xlu1 %2073 }
 0x5f6   : > { %v2076_v10 = vadd.f32 %v2074_v31, %v2070_v17  ;;  %v2545_v17 = vld [vmem:[%s4023_s5 + $0x108] sm:$0xff] }
 0x5f7   : > { %v2080_v21 = vpop.permute.xlu0 %2079 }
 0x5f8   : > { %v2082_v3 = vsub.f32 %v2071_v19, %v2080_v21  ;;  %v2546_v19 = vld [vmem:[%s4023_s5 + $0x110] sm:$0xff] }
 0x5fa   : > { %v2084_v24 = vadd.f32 1e-05, %v2082_v3 }
 0x5fc   : > { %2648 = vrsqrt.f32 %v2084_v24 }
 0x606   : > { %v2649_v45 = vpop.eup %2648 }
 0x607   : > { %2087 = vrot.lane.b32.xlu0 %v2649_v45, %s2660_s14  ;;  %v2548_v45 = vld [vmem:[%s4023_s5 + $0x120] sm:$0xff] }
 0x679   : > { %v2088_v26 = vpop.permute.xlu0 %2087 }
 0x67a   : > { %v2090_v30 = vmul.f32 %v2088_v26, %v2083_v8  ;;  %v2550_v26 = vld [vmem:[%s4023_s5 + $0x130] sm:$0xff] }
 0x67c   : > { %2092 = vrot.lane.b32.xlu1 %v2090_v30, %s2660_s14 }
 0x680   : > { %2102 = vperm.xlu1 %2646, %v2090_v30   ;;  %v2551_v30 = vld [vmem:[%s4023_s5 + $0x138] sm:$0xff] }
 0x6ee   : > { %v2093_v32 = vpop.permute.xlu1 %2092 }
 0x6ef   : > { %v2095_v51 = vmul.f32 %v2093_v32, %v2076_v10 }
 0x6f1   : > { %2097 = vrot.lane.b32.xlu0 %v2095_v51, %s2664_s19  ;;  %v2552_v51 = vld [vmem:[%s4023_s5 + $0x140] sm:$0xff] }
 0x6ff   : > { %v3271_v50 = vpop.permute.xlu1 %2102 }
 0x700   : > { %v3310_v18 = vmul.f32 %v2110_v14, %v3271_v50  ;;  %v3313_v55 = vmul.f32 %v2111_v54, %v3271_v50  ;;  %v3316_v29 = vmul.f32 %v2112_v40, %v3271_v50  ;;  %v3319_v2 = vmul.f32 %v2113_v42, %v3271_v50 }
 0x701   : > { %v3334_v59 = vmul.f32 %v2114_v43, %v3271_v50  ;;  %v3337_v28 = vmul.f32 %v2115_v60, %v3271_v50  ;;  %v3340_v7 = vmul.f32 %v2116_v16, %v3271_v50  ;;  %v3343_v61 = vmul.f32 %v2117_v44, %v3271_v50  ;;  %v2555_v43 = vld [vmem:[%s4023_s5 + $0x158] sm:$0xff]  ;;  %v2556_v60 = vld [vmem:[%s4023_s5 + $0x160] sm:$0xff]  ;;  %v2557_v16 = vld [vmem:[%s4023_s5 + $0x168] sm:$0xff] }
 0x702   : > { %v3358_v13 = vmul.f32 %v2118_v48, %v3271_v50  ;;  %v3361_v39 = vmul.f32 %v2119_v63, %v3271_v50  ;;  %v3364_v37 = vmul.f32 %v2120_v49, %v3271_v50  ;;  %v3367_v52 = vmul.f32 %v2121_v20, %v3271_v50  ;;  %v2558_v20 = vld [vmem:[%s4023_s5 + $0x170] sm:$0xff] }
 0x703   : > { %v3382_v21 = vmul.f32 %v2122_v5, %v3271_v50  ;;  %v3385_v3 = vmul.f32 %v2123_v53, %v3271_v50  ;;  %v3388_v24 = vmul.f32 %v2124_v56, %v3271_v50  ;;  %v3391_v46 = vmul.f32 %v2125_v22, %v3271_v50  ;;  %v2559_v5 = vld [vmem:[%s4023_s5 + $0x178] sm:$0xff]  ;;  %v2560_v53 = vld [vmem:[%s4023_s5 + $0x180] sm:$0xff] }
 0x704   : > { %v3406_v47 = vmul.f32 %v2126_v9, %v3271_v50  ;;  %v3409_v31 = vmul.f32 %v2127_v6, %v3271_v50  ;;  %v3412_v10 = vmul.f32 %v2128_v57, %v3271_v50  ;;  %v3415_v32 = vmul.f32 %v2129_v58, %v3271_v50  ;;  %v2561_v57 = vld [vmem:[%s4023_s5 + $0x188] sm:$0xff]  ;;  %v2562_v58 = vld [vmem:[%s4023_s5 + $0x190] sm:$0xff] }
 0x705   : > { %v3427_v14 = vmul.f32 %v2130_v15, %v3271_v50  ;;  %v3430_v54 = vmul.f32 %v2131_v27, %v3271_v50  ;;  %v3433_v40 = vmul.f32 %v2132_v62, %v3271_v50  ;;  %v3436_v42 = vmul.f32 %v2133_v0, %v3271_v50  ;;  %v2563_v15 = vld [vmem:[%s4023_s5 + $0x198] sm:$0xff] }
 0x706   : > { %v3448_v44 = vmul.f32 %v2134_v25, %v3271_v50  ;;  %v3451_v48 = vmul.f32 %v2135_v23, %v3271_v50  ;;  %v3454_v63 = vmul.f32 %v2136_v4, %v3271_v50  ;;  %v3457_v49 = vmul.f32 %v2137_v33, %v3271_v50  ;;  %v2564_v23 = vld [vmem:[%s4023_s5 + $0x1a0] sm:$0xff]  ;;  %v2565_v4 = vld [vmem:[%s4023_s5 + $0x1a8] sm:$0xff]  ;;  %v2566_v33 = vld [vmem:[%s4023_s5 + $0x1b0] sm:$0xff] }
 0x707   : > { %v3469_v56 = vmul.f32 %v2138_v35, %v3271_v50  ;;  %v3472_v22 = vmul.f32 %v2139_v11, %v3271_v50  ;;  %v3475_v9 = vmul.f32 %v2140_v12, %v3271_v50  ;;  %v3478_v6 = vmul.f32 %v2141_v34, %v3271_v50 }
 0x708   : > { %v3490_v27 = vmul.f32 %v2544_v1, %v3271_v50  ;;  %v3493_v62 = vmul.f32 %v2545_v17, %v3271_v50  ;;  %v3496_v0 = vmul.f32 %v2546_v19, %v3271_v50  ;;  %v3499_v25 = vmul.f32 %v2547_v41, %v3271_v50  ;;  %v2567_v1 = vld [vmem:[%s4023_s5 + $0x1b8] sm:$0xff]  ;;  %v2568_v17 = vld [vmem:[%s4023_s5 + $0x1c0] sm:$0xff]  ;;  %v2569_v19 = vld [vmem:[%s4023_s5 + $0x1c8] sm:$0xff] }
 0x709   : > { %v3511_v35 = vmul.f32 %v2548_v45, %v3271_v50  ;;  %v3517_v12 = vmul.f32 %v2550_v26, %v3271_v50  ;;  %v3520_v34 = vmul.f32 %v2551_v30, %v3271_v50  ;;  %v3532_v41 = vmul.f32 %v2552_v51, %v3271_v50  ;;  %v2570_v30 = vld [vmem:[%s4023_s5 + $0x1d0] sm:$0xff]  ;;  %v2572_v51 = vld [vmem:[%s4023_s5 + $0x1e0] sm:$0xff] }
 0x70a   : > { %v3541_v26 = vmul.f32 %v2555_v43, %v3271_v50  ;;  %v3559_v43 = vmul.f32 %v2558_v20, %v3271_v50  ;;  %v3577_v20 = vmul.f32 %v2561_v57, %v3271_v50  ;;  %v3598_v57 = vmul.f32 %v2568_v17, %v3271_v50 }
 0x70b   : > { %4024 = vst [vmem:[#allocation5_spill] sm:$0xff] %v3520_v34  ;;  %v2571_v34 = vld [vmem:[%s4023_s5 + $0x1d8] sm:$0xff] }
 0x70c   : > { %4027 = vst [vmem:[#allocation8_spill] sm:$0xff] %v3541_v26  ;;  %4030 = vst [vmem:[#allocation11_spill] sm:$0xff] %v3559_v43  ;;  %v3562_v26 = vmul.f32 %v2559_v5, %v3271_v50  ;;  %v3580_v5 = vmul.f32 %v2562_v58, %v3271_v50  ;;  %v3586_v43 = vmul.f32 %v2564_v23, %v3271_v50 }
 0x70d   : > { %v3601_v58 = vmul.f32 %v2569_v19, %v3271_v50  ;;  %v3607_v23 = vmul.f32 %v2571_v34, %v3271_v50 }
 0x70e   : > { %4031 = vst [vmem:[#allocation12_spill] sm:$0xff] %v3562_v26  ;;  %v3583_v26 = vmul.f32 %v2563_v15, %v3271_v50  ;;  %v3604_v15 = vmul.f32 %v2570_v30, %v3271_v50 }
 0x70f   : > { %4032 = vst [vmem:[#allocation13_spill] sm:$0xff] %v3601_v58  ;;  %4034 = vst [vmem:[#allocation15_spill] sm:$0xff] %v3607_v23 }
 0x710   : > { %4033 = vst [vmem:[#allocation14_spill] sm:$0xff] %v3604_v15 }
 0x763   : > { %v2098_v36 = vpop.permute.xlu0 %2097 }
 0x764   : > { %v2100_v38 = vsub.f32 %v2083_v8, %v2098_v36  ;;  %v2549_v8 = vld [vmem:[%s4023_s5 + $0x128] sm:$0xff] }
 0x765   : > { %v2553_v36 = vld [vmem:[%s4023_s5 + $0x148] sm:$0xff]  ;;  %v3514_v11 = vmul.f32 %v2549_v8, %v3271_v50 }
 0x766   : > { %2107 = vperm.xlu0 %2647, %v2100_v38   ;;  %v2554_v38 = vld [vmem:[%s4023_s5 + $0x150] sm:$0xff]  ;;  %v3535_v45 = vmul.f32 %v2553_v36, %v3271_v50  ;;  %v3553_v36 = vmul.f32 %v2556_v60, %v3271_v50  ;;  %v2575_v60 = vld [vmem:[%s4023_s5 + $0x1f8] sm:$0xff] }
 0x767   : > { %v3538_v8 = vmul.f32 %v2554_v38, %v3271_v50  ;;  %v3556_v38 = vmul.f32 %v2557_v16, %v3271_v50  ;;  %v3574_v16 = vmul.f32 %v2560_v53, %v3271_v50  ;;  %v3595_v53 = vmul.f32 %v2567_v1, %v3271_v50 }
 0x768   : > { %4025 = vst [vmem:[#allocation6_spill] sm:$0xff] %v3535_v45  ;;  %4028 = vst [vmem:[#allocation9_spill] sm:$0xff] %v3553_v36  ;;  %v2574_v45 = vld [vmem:[%s4023_s5 + $0x1f0] sm:$0xff]  ;;  %v3592_v36 = vmul.f32 %v2566_v33, %v3271_v50  ;;  %v3619_v17 = vmul.f32 %v2575_v60, %v3271_v50 }
 0x769   : > { %4026 = vst [vmem:[#allocation7_spill] sm:$0xff] %v3538_v8  ;;  %4029 = vst [vmem:[#allocation10_spill] sm:$0xff] %v3556_v38  ;;  %v2573_v8 = vld [vmem:[%s4023_s5 + $0x1e8] sm:$0xff]  ;;  %v3589_v38 = vmul.f32 %v2565_v4, %v3271_v50  ;;  %v3610_v4 = vmul.f32 %v2572_v51, %v3271_v50  ;;  %v3616_v1 = vmul.f32 %v2574_v45, %v3271_v50 }
 0x76a   : > { %v3613_v33 = vmul.f32 %v2573_v8, %v3271_v50  ;;  %4038 = vst [vmem:[#allocation19_spill] sm:$0xff] %v3619_v17 }
 0x76b   : > { %4035 = vst [vmem:[#allocation16_spill] sm:$0xff] %v3610_v4  ;;  %4037 = vst [vmem:[#allocation18_spill] sm:$0xff] %v3616_v1 }
 0x76c   : > { %4036 = vst [vmem:[#allocation17_spill] sm:$0xff] %v3613_v33 }
 0x7e5   : > { %v3621_v19 = vpop.permute.xlu0 %2107 }
 0x7e6   : > { %v2174_v30 = vadd.f32 %v3310_v18, %v3621_v19  ;;  %v2175_v34 = vadd.f32 %v3313_v55, %v3621_v19  ;;  %v2176_v51 = vadd.f32 %v3316_v29, %v3621_v19  ;;  %v2177_v8 = vadd.f32 %v3319_v2, %v3621_v19 }
 0x7e7   : > { %v2178_v45 = vadd.f32 %v3334_v59, %v3621_v19  ;;  %v2179_v50 = vadd.f32 %v3337_v28, %v3621_v19  ;;  %v2180_v60 = vadd.f32 %v3340_v7, %v3621_v19  ;;  %v2181_v18 = vadd.f32 %v3343_v61, %v3621_v19 }
 0x7e8   : > { %v2182_v55 = vadd.f32 %v3358_v13, %v3621_v19  ;;  %v2183_v29 = vadd.f32 %v3361_v39, %v3621_v19  ;;  %v2184_v2 = vadd.f32 %v3364_v37, %v3621_v19  ;;  %v2185_v59 = vadd.f32 %v3367_v52, %v3621_v19 }
 0x7e9   : > { %v2186_v28 = vadd.f32 %v3382_v21, %v3621_v19  ;;  %v2187_v7 = vadd.f32 %v3385_v3, %v3621_v19  ;;  %v2188_v61 = vadd.f32 %v3388_v24, %v3621_v19  ;;  %v2189_v13 = vadd.f32 %v3391_v46, %v3621_v19 }
 0x7ea   : > { %v2190_v39 = vadd.f32 %v3406_v47, %v3621_v19  ;;  %v2191_v37 = vadd.f32 %v3409_v31, %v3621_v19  ;;  %v2192_v52 = vadd.f32 %v3412_v10, %v3621_v19  ;;  %v2193_v21 = vadd.f32 %v3415_v32, %v3621_v19 }
 0x7eb   : > { %v3665_v3 = vadd.f32 %v3427_v14, %v3621_v19  ;;  %v3669_v24 = vadd.f32 %v3430_v54, %v3621_v19  ;;  %v3673_v46 = vadd.f32 %v3433_v40, %v3621_v19  ;;  %v3677_v47 = vadd.f32 %v3436_v42, %v3621_v19 }
 0x7ec   : > { %v3681_v31 = vadd.f32 %v3448_v44, %v3621_v19  ;;  %v3685_v10 = vadd.f32 %v3451_v48, %v3621_v19  ;;  %v3689_v32 = vadd.f32 %v3454_v63, %v3621_v19  ;;  %v3693_v14 = vadd.f32 %v3457_v49, %v3621_v19 }
 0x7ed   : > { %v3697_v54 = vadd.f32 %v3469_v56, %v3621_v19  ;;  %v3701_v40 = vadd.f32 %v3472_v22, %v3621_v19  ;;  %v3705_v42 = vadd.f32 %v3475_v9, %v3621_v19  ;;  %v3709_v44 = vadd.f32 %v3478_v6, %v3621_v19 }
 0x7ee   : > { %v2206_v48 = vmax.f32 %v2174_v30, 0.0  ;;  %v2207_v63 = vmax.f32 %v2175_v34, 0.0  ;;  %v2208_v49 = vmax.f32 %v2176_v51, 0.0  ;;  %v2209_v17 = vmax.f32 %v2177_v8, 0.0 }
 0x7ef   : > { %v2210_v1 = vmax.f32 %v2178_v45, 0.0  ;;  %v2211_v33 = vmax.f32 %v2179_v50, 0.0  ;;  %v2212_v56 = vmax.f32 %v2180_v60, 0.0  ;;  %v2213_v4 = vmax.f32 %v2181_v18, 0.0 }
 0x7f0   : > { %v2214_v23 = vmax.f32 %v2182_v55, 0.0  ;;  %v2215_v15 = vmax.f32 %v2183_v29, 0.0  ;;  %v2216_v22 = vmax.f32 %v2184_v2, 0.0  ;;  %v2217_v58 = vmax.f32 %v2185_v59, 0.0  ;;  %2238 = vst [vmem:[%s4023_s5] sm:$0xff] %v2206_v48  ;;  %2239 = vst [vmem:[%s4023_s5 + $0x8] sm:$0xff] %v2207_v63  ;;  %v4048_v63 = vld [vmem:[#allocation14_spill] sm:$0xff] }
 0x7f1   : > { %2240 = vst [vmem:[%s4023_s5 + $0x10] sm:$0xff] %v2208_v49  ;;  %2241 = vst [vmem:[%s4023_s5 + $0x18] sm:$0xff] %v2209_v17  ;;  %v2218_v9 = vmax.f32 %v2186_v28, 0.0  ;;  %v2219_v6 = vmax.f32 %v2187_v7, 0.0  ;;  %v2220_v30 = vmax.f32 %v2188_v61, 0.0  ;;  %v2221_v34 = vmax.f32 %v2189_v13, 0.0 }
 0x7f2   : > { %2242 = vst [vmem:[%s4023_s5 + $0x20] sm:$0xff] %v2210_v1  ;;  %2243 = vst [vmem:[%s4023_s5 + $0x28] sm:$0xff] %v2211_v33  ;;  %v2222_v17 = vmax.f32 %v2190_v39, 0.0  ;;  %v2223_v51 = vmax.f32 %v2191_v37, 0.0  ;;  %v2224_v8 = vmax.f32 %v2192_v52, 0.0  ;;  %v2225_v45 = vmax.f32 %v2193_v21, 0.0 }
 0x7f3   : > { %2244 = vst [vmem:[%s4023_s5 + $0x30] sm:$0xff] %v2212_v56  ;;  %2245 = vst [vmem:[%s4023_s5 + $0x38] sm:$0xff] %v2213_v4  ;;  %v2226_v4 = vmax.f32 %v3665_v3, 0.0  ;;  %v2227_v33 = vmax.f32 %v3669_v24, 0.0  ;;  %v2228_v1 = vmax.f32 %v3673_v46, 0.0  ;;  %v2232_v50 = vmax.f32 %v3689_v32, 0.0 }
 0x7f4   : > { %2246 = vst [vmem:[%s4023_s5 + $0x40] sm:$0xff] %v2214_v23  ;;  %2247 = vst [vmem:[%s4023_s5 + $0x48] sm:$0xff] %v2215_v15  ;;  %v2229_v23 = vmax.f32 %v3677_v47, 0.0  ;;  %v2231_v15 = vmax.f32 %v3685_v10, 0.0  ;;  %v2233_v60 = vmax.f32 %v3693_v14, 0.0  ;;  %v2234_v18 = vmax.f32 %v3697_v54, 0.0 }
 0x7f5   : > { %2248 = vst [vmem:[%s4023_s5 + $0x50] sm:$0xff] %v2216_v22  ;;  %2249 = vst [vmem:[%s4023_s5 + $0x58] sm:$0xff] %v2217_v58  ;;  %v2230_v58 = vmax.f32 %v3681_v31, 0.0  ;;  %v2235_v55 = vmax.f32 %v3701_v40, 0.0  ;;  %v2236_v29 = vmax.f32 %v3705_v42, 0.0  ;;  %v2237_v2 = vmax.f32 %v3709_v44, 0.0 }
 0x7f6   : > { %2250 = vst [vmem:[%s4023_s5 + $0x60] sm:$0xff] %v2218_v9  ;;  %2251 = vst [vmem:[%s4023_s5 + $0x68] sm:$0xff] %v2219_v6  ;;  %v2335_v59 = vadd.f32 %v3490_v27, %v3621_v19  ;;  %v2336_v28 = vadd.f32 %v3493_v62, %v3621_v19  ;;  %v2337_v7 = vadd.f32 %v3496_v0, %v3621_v19  ;;  %v4040_v37 = vld [vmem:[#allocation6_spill] sm:$0xff]  ;;  %v4041_v21 = vld [vmem:[#allocation7_spill] sm:$0xff] }
 0x7f7   : > { %2252 = vst [vmem:[%s4023_s5 + $0x70] sm:$0xff] %v2220_v30  ;;  %2253 = vst [vmem:[%s4023_s5 + $0x78] sm:$0xff] %v2221_v34  ;;  %v2338_v61 = vadd.f32 %v3499_v25, %v3621_v19  ;;  %v2339_v27 = vadd.f32 %v3511_v35, %v3621_v19  ;;  %v2340_v62 = vadd.f32 %v3514_v11, %v3621_v19  ;;  %v4039_v25 = vld [vmem:[#allocation5_spill] sm:$0xff]  ;;  %v4042_v35 = vld [vmem:[#allocation8_spill] sm:$0xff] }
 0x7f8   : > { %2254 = vst [vmem:[%s4023_s5 + $0x80] sm:$0xff] %v2222_v17  ;;  %2255 = vst [vmem:[%s4023_s5 + $0x88] sm:$0xff] %v2223_v51  ;;  %v2341_v0 = vadd.f32 %v3517_v12, %v3621_v19  ;;  %v2342_v13 = vadd.f32 %v4039_v25, %v3621_v19  ;;  %v2343_v39 = vadd.f32 %v3532_v41, %v3621_v19  ;;  %v4043_v11 = vld [vmem:[#allocation9_spill] sm:$0xff]  ;;  %v4044_v12 = vld [vmem:[#allocation10_spill] sm:$0xff]  ;;  %v2367_v17 = vmax.f32 %v2335_v59, 0.0 }
 0x7f9   : > { %2256 = vst [vmem:[%s4023_s5 + $0x90] sm:$0xff] %v2224_v8  ;;  %2257 = vst [vmem:[%s4023_s5 + $0x98] sm:$0xff] %v2225_v45  ;;  %v2344_v52 = vadd.f32 %v4040_v37, %v3621_v19  ;;  %v2345_v3 = vadd.f32 %v4041_v21, %v3621_v19  ;;  %v2346_v24 = vadd.f32 %v4042_v35, %v3621_v19  ;;  %v4045_v31 = vld [vmem:[#allocation11_spill] sm:$0xff]  ;;  %v4046_v41 = vld [vmem:[#allocation12_spill] sm:$0xff]  ;;  %v2368_v51 = vmax.f32 %v2336_v28, 0.0 }
 0x7fa   : > { %2258 = vst [vmem:[%s4023_s5 + $0xa0] sm:$0xff] %v2226_v4  ;;  %2259 = vst [vmem:[%s4023_s5 + $0xa8] sm:$0xff] %v2227_v33  ;;  %v2347_v46 = vadd.f32 %v4043_v11, %v3621_v19  ;;  %v2348_v47 = vadd.f32 %v4044_v12, %v3621_v19  ;;  %v2349_v10 = vadd.f32 %v4045_v31, %v3621_v19  ;;  %v4049_v49 = vld [vmem:[#allocation15_spill] sm:$0xff]  ;;  %v4050_v56 = vld [vmem:[#allocation16_spill] sm:$0xff]  ;;  %v2369_v8 = vmax.f32 %v2337_v7, 0.0 }
 0x7fb   : > { %2260 = vst [vmem:[%s4023_s5 + $0xb0] sm:$0xff] %v2228_v1  ;;  %2261 = vst [vmem:[%s4023_s5 + $0xb8] sm:$0xff] %v2229_v23  ;;  %v2350_v32 = vadd.f32 %v4046_v41, %v3621_v19  ;;  %v2351_v14 = vadd.f32 %v3574_v16, %v3621_v19  ;;  %v2352_v54 = vadd.f32 %v3577_v20, %v3621_v19  ;;  %v4051_v22 = vld [vmem:[#allocation17_spill] sm:$0xff]  ;;  %v4052_v9 = vld [vmem:[#allocation18_spill] sm:$0xff]  ;;  %v2370_v45 = vmax.f32 %v2338_v61, 0.0 }
 0x7fc   : > { %2262 = vst [vmem:[%s4023_s5 + $0xc0] sm:$0xff] %v2230_v58  ;;  %2263 = vst [vmem:[%s4023_s5 + $0xc8] sm:$0xff] %v2231_v15  ;;  %v2353_v40 = vadd.f32 %v3580_v5, %v3621_v19  ;;  %v2354_v42 = vadd.f32 %v3583_v26, %v3621_v19  ;;  %v3861_v44 = vadd.f32 %v3586_v43, %v3621_v19  ;;  %v4047_v26 = vld [vmem:[#allocation13_spill] sm:$0xff]  ;;  %v4053_v30 = vld [vmem:[#allocation19_spill] sm:$0xff]  ;;  %v2371_v4 = vmax.f32 %v2339_v27, 0.0 }
 0x7fd   : > { %2264 = vst [vmem:[%s4023_s5 + $0xd0] sm:$0xff] %v2232_v50  ;;  %2265 = vst [vmem:[%s4023_s5 + $0xd8] sm:$0xff] %v2233_v60  ;;  %v3865_v48 = vadd.f32 %v3589_v38, %v3621_v19  ;;  %v3869_v16 = vadd.f32 %v3592_v36, %v3621_v19  ;;  %v3873_v20 = vadd.f32 %v3595_v53, %v3621_v19  ;;  %v2372_v33 = vmax.f32 %v2340_v62, 0.0 }
 0x7fe   : > { %2266 = vst [vmem:[%s4023_s5 + $0xe0] sm:$0xff] %v2234_v18  ;;  %2267 = vst [vmem:[%s4023_s5 + $0xe8] sm:$0xff] %v2235_v55  ;;  %v3877_v5 = vadd.f32 %v3598_v57, %v3621_v19  ;;  %v3881_v43 = vadd.f32 %v4047_v26, %v3621_v19  ;;  %v3885_v38 = vadd.f32 %v4048_v63, %v3621_v19  ;;  %v2373_v1 = vmax.f32 %v2341_v0, 0.0 }
 0x7ff   : > { %2268 = vst [vmem:[%s4023_s5 + $0xf0] sm:$0xff] %v2236_v29  ;;  %2269 = vst [vmem:[%s4023_s5 + $0xf8] sm:$0xff] %v2237_v2  ;;  %v3889_v36 = vadd.f32 %v4049_v49, %v3621_v19  ;;  %v3893_v53 = vadd.f32 %v4050_v56, %v3621_v19  ;;  %v3897_v57 = vadd.f32 %v4051_v22, %v3621_v19  ;;  %v2374_v23 = vmax.f32 %v2342_v13, 0.0 }
 0x800   : > { %v3901_v6 = vadd.f32 %v4052_v9, %v3621_v19  ;;  %v3905_v34 = vadd.f32 %v4053_v30, %v3621_v19  ;;  %v2375_v58 = vmax.f32 %v2343_v39, 0.0  ;;  %v2376_v15 = vmax.f32 %v2344_v52, 0.0  ;;  %2576 = vst [vmem:[%s4023_s5 + $0x100] sm:$0xff] %v2367_v17  ;;  %2577 = vst [vmem:[%s4023_s5 + $0x108] sm:$0xff] %v2368_v51 }
 0x801   : > { %v2377_v50 = vmax.f32 %v2345_v3, 0.0  ;;  %v2378_v60 = vmax.f32 %v2346_v24, 0.0  ;;  %2578 = vst [vmem:[%s4023_s5 + $0x110] sm:$0xff] %v2369_v8  ;;  %2579 = vst [vmem:[%s4023_s5 + $0x118] sm:$0xff] %v2370_v45  ;;  %v2379_v19 = vmax.f32 %v2347_v46, 0.0  ;;  %v2380_v18 = vmax.f32 %v2348_v47, 0.0 }
 0x802   : > { %v2381_v55 = vmax.f32 %v2349_v10, 0.0  ;;  %v2382_v29 = vmax.f32 %v2350_v32, 0.0  ;;  %2580 = vst [vmem:[%s4023_s5 + $0x120] sm:$0xff] %v2371_v4  ;;  %2581 = vst [vmem:[%s4023_s5 + $0x128] sm:$0xff] %v2372_v33  ;;  %v2383_v2 = vmax.f32 %v2351_v14, 0.0  ;;  %v2384_v59 = vmax.f32 %v2352_v54, 0.0 }
 0x803   : > { %2582 = vst [vmem:[%s4023_s5 + $0x130] sm:$0xff] %v2373_v1  ;;  %2583 = vst [vmem:[%s4023_s5 + $0x138] sm:$0xff] %v2374_v23  ;;  %v2385_v28 = vmax.f32 %v2353_v40, 0.0  ;;  %v2386_v7 = vmax.f32 %v2354_v42, 0.0  ;;  %v2387_v61 = vmax.f32 %v3861_v44, 0.0  ;;  %v2388_v27 = vmax.f32 %v3865_v48, 0.0 }
 0x804   : > { %2584 = vst [vmem:[%s4023_s5 + $0x140] sm:$0xff] %v2375_v58  ;;  %2585 = vst [vmem:[%s4023_s5 + $0x148] sm:$0xff] %v2376_v15  ;;  %v2389_v62 = vmax.f32 %v3869_v16, 0.0  ;;  %v2390_v0 = vmax.f32 %v3873_v20, 0.0  ;;  %v2391_v25 = vmax.f32 %v3877_v5, 0.0  ;;  %v2392_v13 = vmax.f32 %v3881_v43, 0.0 }
 0x805   : > { %2586 = vst [vmem:[%s4023_s5 + $0x150] sm:$0xff] %v2377_v50  ;;  %2587 = vst [vmem:[%s4023_s5 + $0x158] sm:$0xff] %v2378_v60  ;;  %v2393_v39 = vmax.f32 %v3885_v38, 0.0  ;;  %v2394_v37 = vmax.f32 %v3889_v36, 0.0  ;;  %v2395_v52 = vmax.f32 %v3893_v53, 0.0  ;;  %v2396_v21 = vmax.f32 %v3897_v57, 0.0 }
 0x806   : > { %2588 = vst [vmem:[%s4023_s5 + $0x160] sm:$0xff] %v2379_v19  ;;  %2589 = vst [vmem:[%s4023_s5 + $0x168] sm:$0xff] %v2380_v18  ;;  %v2397_v3 = vmax.f32 %v3901_v6, 0.0  ;;  %v2398_v35 = vmax.f32 %v3905_v34, 0.0 }
 0x807   : > { %2590 = vst [vmem:[%s4023_s5 + $0x170] sm:$0xff] %v2381_v55  ;;  %2591 = vst [vmem:[%s4023_s5 + $0x178] sm:$0xff] %v2382_v29 }
 0x808   : > { %2592 = vst [vmem:[%s4023_s5 + $0x180] sm:$0xff] %v2383_v2  ;;  %2593 = vst [vmem:[%s4023_s5 + $0x188] sm:$0xff] %v2384_v59 }
 0x809   : > { %2594 = vst [vmem:[%s4023_s5 + $0x190] sm:$0xff] %v2385_v28  ;;  %2595 = vst [vmem:[%s4023_s5 + $0x198] sm:$0xff] %v2386_v7 }
 0x80a   : > { %2596 = vst [vmem:[%s4023_s5 + $0x1a0] sm:$0xff] %v2387_v61  ;;  %2597 = vst [vmem:[%s4023_s5 + $0x1a8] sm:$0xff] %v2388_v27 }
 0x80b   : > { %2598 = vst [vmem:[%s4023_s5 + $0x1b0] sm:$0xff] %v2389_v62  ;;  %2599 = vst [vmem:[%s4023_s5 + $0x1b8] sm:$0xff] %v2390_v0 }
 0x80c   : > { %2600 = vst [vmem:[%s4023_s5 + $0x1c0] sm:$0xff] %v2391_v25  ;;  %2601 = vst [vmem:[%s4023_s5 + $0x1c8] sm:$0xff] %v2392_v13 }
 0x80d   : > { %2602 = vst [vmem:[%s4023_s5 + $0x1d0] sm:$0xff] %v2393_v39  ;;  %2603 = vst [vmem:[%s4023_s5 + $0x1d8] sm:$0xff] %v2394_v37 }
 0x80e   : > { %2604 = vst [vmem:[%s4023_s5 + $0x1e0] sm:$0xff] %v2395_v52  ;;  %2605 = vst [vmem:[%s4023_s5 + $0x1e8] sm:$0xff] %v2396_v21 }
 0x80f   : > { %2606 = vst [vmem:[%s4023_s5 + $0x1f0] sm:$0xff] %v2397_v3  ;;  %2607 = vst [vmem:[%s4023_s5 + $0x1f8] sm:$0xff] %v2398_v35 }
 0x810 PF: > { %s15_s18 = sadd.s32 1, %s2656_s18  }
 0x811   : > { %p12_p6 = scmp.ge.s32.totalorder %s15_s18, 4  }
 0x813   :  { %14 = sbr.rel (!%p12_p6) target bundleno = 1 (0x1), region = 76 }

</bundles_post_ra>
